<compile_context>
chip_gen: v7x
topology: tpu7x:2x2x1
jax: 0.10.0
libtpu: 0.0.40
codegen_flags: <defaults>
</compile_context>

<pallas_src>
import jax
import jax.numpy as jnp
from jax import lax
from jax.experimental import pallas as pl
from jax.experimental.pallas import tpu as pltpu

K = 3  # the module hardcodes padding=1, so kernel_size=3 keeps spatial dims


def _sepconv_kernel(dww_ref, pww_ref, bias_ref, x_ref, o_ref, xpad_ref):
    """Fused depthwise-3x3 + pointwise-1x1 for one (batch, row-strip) grid cell.

    dww_ref : (Cin*9,)    SMEM   depthwise weights, index [c*9 + kh*3 + kw]
    pww_ref : (Cout*Cin,) SMEM   pointwise weights, index [co*Cin + c]
    bias_ref: (Cout,)     SMEM   fused bias = pw_w @ dw_b + pw_b
    x_ref   : (1, Cin, H, W)     full image for this batch element (VMEM)
    o_ref   : (1, Cout, TH, W)   output row strip (VMEM)
    xpad_ref: (Cin, H+2, W+2)    zero-padded image scratch (VMEM)
    """
    cin = x_ref.shape[1]
    H, W = x_ref.shape[2], x_ref.shape[3]
    cout, tile_h = o_ref.shape[1], o_ref.shape[2]

    s = pl.program_id(1)
    r0 = pl.multiple_of(s * tile_h, tile_h)  # first padded row of this strip

    # ---- halo handled in-kernel: zero-pad the image into VMEM scratch ------
    xpad_ref[...] = jnp.zeros_like(xpad_ref)
    xpad_ref[:, 1:H + 1, 1:W + 1] = x_ref[0].astype(jnp.float32)

    # ---- depthwise 3x3 + pointwise 1x1, fully on the VPU -------------------
    out_acc = [None] * cout
    for c in range(cin):
        # rows [r0, r0 + tile_h + 2) of the padded image for this strip.
        # W stays on the lane axis: kw shifts are lane shifts, kh shifts are
        # sublane row offsets of this slab.
        slab = xpad_ref[c, pl.ds(r0, tile_h + 2), :]
        dw = None
        for kh in range(K):
            for kw in range(K):
                w = dww_ref[c * (K * K) + kh * K + kw]          # SMEM scalar
                tap = slab[kh:kh + tile_h, kw:kw + W] * w
                dw = tap if dw is None else dw + tap
        # pointwise 1x1: scatter channel c into every output channel.
        for co in range(cout):
            contrib = dw * pww_ref[co * cin + c]                # SMEM scalar
            out_acc[co] = contrib if out_acc[co] is None else out_acc[co] + contrib

    for co in range(cout):
        o_ref[0, co] = (out_acc[co] + bias_ref[co]).astype(o_ref.dtype)


@jax.jit
def sepconv2d(x_nchw, dw_w, dw_b, pw_w, pw_b):
    """SepConv2D forward.

    x_nchw: (B, Cin, H, W)
    dw_w  : (Cin, 1, 3, 3)   (PyTorch depthwise weight layout)
    dw_b  : (Cin,)
    pw_w  : (Cout, Cin, 1, 1)
    pw_b  : (Cout,)
    returns (B, Cout, H, W)
    """
    B, Cin, H, W = x_nchw.shape
    Cout = pw_b.shape[0]

    tile_h = 8 if H % 8 == 0 else H          # row-strip height (grid depth / VMEM lever)
    n_strips = H // tile_h

    # Tiny parameter repack (parameter-sized work only; no activation-sized
    # transpose or pad in the wrapper).
    pw2d = pw_w[:, :, 0, 0].astype(jnp.float32)                    # (Cout, Cin)
    dww = dw_w[:, 0].astype(jnp.float32).reshape(Cin * K * K)      # (Cin*9,)
    pww = pw2d.reshape(Cout * Cin)                                 # (Cout*Cin,)
    bias = pw2d @ dw_b.astype(jnp.float32) + pw_b.astype(jnp.float32)  # fused bias

    smem_spec = pl.BlockSpec(memory_space=pltpu.MemorySpace.SMEM)

    return pl.pallas_call(
        _sepconv_kernel,
        out_shape=jax.ShapeDtypeStruct((B, Cout, H, W), x_nchw.dtype),
        grid_spec=pltpu.PrefetchScalarGridSpec(
            num_scalar_prefetch=0,
            grid=(B, n_strips),
            in_specs=[
                smem_spec,                                          # dww
                smem_spec,                                          # pww
                smem_spec,                                          # fused bias
                pl.BlockSpec((1, Cin, H, W), lambda b, s: (b, 0, 0, 0)),
            ],
            out_specs=pl.BlockSpec((1, Cout, tile_h, W),
                                   lambda b, s: (b, 0, s, 0)),
            scratch_shapes=[pltpu.VMEM((Cin, H + 2, W + 2), jnp.float32)],
        ),
        compiler_params=pltpu.CompilerParams(
            dimension_semantics=("parallel", "parallel")),
    )(dww, pww, bias, x_nchw)


def _reference(x_nchw, dw_w, dw_b, pw_w, pw_b):
    """Pure-JAX reference matching PyTorch conv semantics."""
    Cin = x_nchw.shape[1]
    dn = ('NCHW', 'OIHW', 'NCHW')
    dw = lax.conv_general_dilated(
        x_nchw, dw_w, window_strides=(1, 1), padding=((1, 1), (1, 1)),
        dimension_numbers=dn, feature_group_count=Cin,
        precision=lax.Precision.HIGHEST)
    dw = dw + dw_b.reshape(1, -1, 1, 1)
    pw = lax.conv_general_dilated(
        dw, pw_w, window_strides=(1, 1), padding=((0, 0), (0, 0)),
        dimension_numbers=dn, precision=lax.Precision.HIGHEST)
    return pw + pw_b.reshape(1, -1, 1, 1)


if __name__ == "__main__":
    B, Cin, Cout, H, W = 2, 4, 8, 16, 16

    key = jax.random.PRNGKey(0)
    kx, k1, k2, k3, k4 = jax.random.split(key, 5)

    x = jax.random.normal(kx, (B, Cin, H, W), dtype=jnp.float32)
    # Deterministic synthetic parameters (same shapes as nn.Conv2d weights).
    dw_w = 0.1 * jax.random.normal(k1, (Cin, 1, K, K), dtype=jnp.float32)
    dw_b = 0.1 * jax.random.normal(k2, (Cin,), dtype=jnp.float32)
    pw_w = 0.1 * jax.random.normal(k3, (Cout, Cin, 1, 1), dtype=jnp.float32)
    pw_b = 0.1 * jax.random.normal(k4, (Cout,), dtype=jnp.float32)

    out = jax.block_until_ready(sepconv2d(x, dw_w, dw_b, pw_w, pw_b))

    ref = _reference(x, dw_w, dw_b, pw_w, pw_b)
    assert out.shape == (B, Cout, H, W)
    assert jnp.allclose(out, ref, atol=1e-4, rtol=1e-4), "mismatch vs reference"

    print("KERNEL_OK")
</pallas_src>

<mosaic_0001>
module attributes {stable_mosaic.version = 11 : i64} {
  func.func @_sepconv_kernel(%arg0: i32, %arg1: i32, %arg2: memref<36xf32, #tpu.memory_space<smem>>, %arg3: memref<32xf32, #tpu.memory_space<smem>>, %arg4: memref<8xf32, #tpu.memory_space<smem>>, %arg5: memref<1x4x16x16xf32, #tpu.memory_space<vmem>>, %arg6: memref<1x8x8x16xf32, #tpu.memory_space<vmem>>, %arg7: memref<4x18x18xf32, #tpu.memory_space<vmem>>) attributes {dimension_semantics = [#tpu.dimension_semantics<parallel>, #tpu.dimension_semantics<parallel>], iteration_bounds = array<i64: 2, 2>, scalar_prefetch = 0 : i64, scratch_operands = 1 : i64, tpu.core_type = #tpu.core_type<tc>, window_params = [{transform_indices = @transform_0, window_bounds = array<i64: 36>}, {transform_indices = @transform_1, window_bounds = array<i64: 32>}, {transform_indices = @transform_2, window_bounds = array<i64: 8>}, {transform_indices = @transform_3, window_bounds = array<i64: 1, 4, 16, 16>}, {transform_indices = @transform_4, window_bounds = array<i64: 1, 8, 8, 16>}]} {
    %c8_i32 = arith.constant 8 : i32
    %0 = arith.muli %arg1, %c8_i32 : i32
    %1 = tpu.assume_multiple %0, 8 : i32
    %cst = arith.constant 0.000000e+00 : f32
    %2 = vector.broadcast %cst : f32 to vector<4x18x18xf32>
    %c0 = arith.constant 0 : index
    %c0_0 = arith.constant 0 : index
    %c0_1 = arith.constant 0 : index
    %3 = vector.load %arg7[%c0, %c0_0, %c0_1] : memref<4x18x18xf32, #tpu.memory_space<vmem>>, vector<4x18x18xf32>
    tpu.vector_store %arg7[%c0, %c0_0, %c0_1], %2 {strides = array<i32>} : memref<4x18x18xf32, #tpu.memory_space<vmem>>, vector<4x18x18xf32>,
    %c0_2 = arith.constant 0 : index
    %c0_3 = arith.constant 0 : index
    %c0_4 = arith.constant 0 : index
    %c0_5 = arith.constant 0 : index
    %4 = vector.load %arg5[%c0_2, %c0_3, %c0_4, %c0_5] : memref<1x4x16x16xf32, #tpu.memory_space<vmem>>, vector<1x4x16x16xf32>
    %5 = vector.shape_cast %4 : vector<1x4x16x16xf32> to vector<4x16x16xf32>
    %c0_6 = arith.constant 0 : index
    %c1 = arith.constant 1 : index
    %c1_7 = arith.constant 1 : index
    %6 = vector.load %arg7[%c0_6, %c1, %c1_7] : memref<4x18x18xf32, #tpu.memory_space<vmem>>, vector<4x16x16xf32>
    tpu.vector_store %arg7[%c0_6, %c1, %c1_7], %5 {strides = array<i32>} : memref<4x18x18xf32, #tpu.memory_space<vmem>>, vector<4x16x16xf32>,
    %c0_8 = arith.constant 0 : index
    %7 = arith.index_cast %1 : i32 to index
    %c0_9 = arith.constant 0 : index
    %8 = vector.load %arg7[%c0_8, %7, %c0_9] : memref<4x18x18xf32, #tpu.memory_space<vmem>>, vector<1x10x18xf32>
    %9 = vector.shape_cast %8 : vector<1x10x18xf32> to vector<10x18xf32>
    %c0_10 = arith.constant 0 : index
    %10 = memref.load %arg2[%c0_10] : memref<36xf32, #tpu.memory_space<smem>>
    %11 = vector.extract_strided_slice %9 {offsets = [0, 0], sizes = [8, 16], strides = [1, 1]} : vector<10x18xf32> to vector<8x16xf32>
    %12 = vector.broadcast %10 : f32 to vector<8x16xf32>
    %13 = arith.mulf %11, %12 : vector<8x16xf32>
    %c1_11 = arith.constant 1 : index
    %14 = memref.load %arg2[%c1_11] : memref<36xf32, #tpu.memory_space<smem>>
    %15 = vector.extract_strided_slice %9 {offsets = [0, 1], sizes = [8, 16], strides = [1, 1]} : vector<10x18xf32> to vector<8x16xf32>
    %16 = vector.broadcast %14 : f32 to vector<8x16xf32>
    %17 = arith.mulf %15, %16 : vector<8x16xf32>
    %18 = arith.addf %13, %17 : vector<8x16xf32>
    %c2 = arith.constant 2 : index
    %19 = memref.load %arg2[%c2] : memref<36xf32, #tpu.memory_space<smem>>
    %20 = vector.extract_strided_slice %9 {offsets = [0, 2], sizes = [8, 16], strides = [1, 1]} : vector<10x18xf32> to vector<8x16xf32>
    %21 = vector.broadcast %19 : f32 to vector<8x16xf32>
    %22 = arith.mulf %20, %21 : vector<8x16xf32>
    %23 = arith.addf %18, %22 : vector<8x16xf32>
    %c3 = arith.constant 3 : index
    %24 = memref.load %arg2[%c3] : memref<36xf32, #tpu.memory_space<smem>>
    %25 = vector.extract_strided_slice %9 {offsets = [1, 0], sizes = [8, 16], strides = [1, 1]} : vector<10x18xf32> to vector<8x16xf32>
    %26 = vector.broadcast %24 : f32 to vector<8x16xf32>
    %27 = arith.mulf %25, %26 : vector<8x16xf32>
    %28 = arith.addf %23, %27 : vector<8x16xf32>
    %c4 = arith.constant 4 : index
    %29 = memref.load %arg2[%c4] : memref<36xf32, #tpu.memory_space<smem>>
    %30 = vector.extract_strided_slice %9 {offsets = [1, 1], sizes = [8, 16], strides = [1, 1]} : vector<10x18xf32> to vector<8x16xf32>
    %31 = vector.broadcast %29 : f32 to vector<8x16xf32>
    %32 = arith.mulf %30, %31 : vector<8x16xf32>
    %33 = arith.addf %28, %32 : vector<8x16xf32>
    %c5 = arith.constant 5 : index
    %34 = memref.load %arg2[%c5] : memref<36xf32, #tpu.memory_space<smem>>
    %35 = vector.extract_strided_slice %9 {offsets = [1, 2], sizes = [8, 16], strides = [1, 1]} : vector<10x18xf32> to vector<8x16xf32>
    %36 = vector.broadcast %34 : f32 to vector<8x16xf32>
    %37 = arith.mulf %35, %36 : vector<8x16xf32>
    %38 = arith.addf %33, %37 : vector<8x16xf32>
    %c6 = arith.constant 6 : index
    %39 = memref.load %arg2[%c6] : memref<36xf32, #tpu.memory_space<smem>>
    %40 = vector.extract_strided_slice %9 {offsets = [2, 0], sizes = [8, 16], strides = [1, 1]} : vector<10x18xf32> to vector<8x16xf32>
    %41 = vector.broadcast %39 : f32 to vector<8x16xf32>
    %42 = arith.mulf %40, %41 : vector<8x16xf32>
    %43 = arith.addf %38, %42 : vector<8x16xf32>
    %c7 = arith.constant 7 : index
    %44 = memref.load %arg2[%c7] : memref<36xf32, #tpu.memory_space<smem>>
    %45 = vector.extract_strided_slice %9 {offsets = [2, 1], sizes = [8, 16], strides = [1, 1]} : vector<10x18xf32> to vector<8x16xf32>
    %46 = vector.broadcast %44 : f32 to vector<8x16xf32>
    %47 = arith.mulf %45, %46 : vector<8x16xf32>
    %48 = arith.addf %43, %47 : vector<8x16xf32>
    %c8 = arith.constant 8 : index
    %49 = memref.load %arg2[%c8] : memref<36xf32, #tpu.memory_space<smem>>
    %50 = vector.extract_strided_slice %9 {offsets = [2, 2], sizes = [8, 16], strides = [1, 1]} : vector<10x18xf32> to vector<8x16xf32>
    %51 = vector.broadcast %49 : f32 to vector<8x16xf32>
    %52 = arith.mulf %50, %51 : vector<8x16xf32>
    %53 = arith.addf %48, %52 : vector<8x16xf32>
    %c0_12 = arith.constant 0 : index
    %54 = memref.load %arg3[%c0_12] : memref<32xf32, #tpu.memory_space<smem>>
    %55 = vector.broadcast %54 : f32 to vector<8x16xf32>
    %56 = arith.mulf %53, %55 : vector<8x16xf32>
    %c4_13 = arith.constant 4 : index
    %57 = memref.load %arg3[%c4_13] : memref<32xf32, #tpu.memory_space<smem>>
    %58 = vector.broadcast %57 : f32 to vector<8x16xf32>
    %59 = arith.mulf %53, %58 : vector<8x16xf32>
    %c8_14 = arith.constant 8 : index
    %60 = memref.load %arg3[%c8_14] : memref<32xf32, #tpu.memory_space<smem>>
    %61 = vector.broadcast %60 : f32 to vector<8x16xf32>
    %62 = arith.mulf %53, %61 : vector<8x16xf32>
    %c12 = arith.constant 12 : index
    %63 = memref.load %arg3[%c12] : memref<32xf32, #tpu.memory_space<smem>>
    %64 = vector.broadcast %63 : f32 to vector<8x16xf32>
    %65 = arith.mulf %53, %64 : vector<8x16xf32>
    %c16 = arith.constant 16 : index
    %66 = memref.load %arg3[%c16] : memref<32xf32, #tpu.memory_space<smem>>
    %67 = vector.broadcast %66 : f32 to vector<8x16xf32>
    %68 = arith.mulf %53, %67 : vector<8x16xf32>
    %c20 = arith.constant 20 : index
    %69 = memref.load %arg3[%c20] : memref<32xf32, #tpu.memory_space<smem>>
    %70 = vector.broadcast %69 : f32 to vector<8x16xf32>
    %71 = arith.mulf %53, %70 : vector<8x16xf32>
    %c24 = arith.constant 24 : index
    %72 = memref.load %arg3[%c24] : memref<32xf32, #tpu.memory_space<smem>>
    %73 = vector.broadcast %72 : f32 to vector<8x16xf32>
    %74 = arith.mulf %53, %73 : vector<8x16xf32>
    %c28 = arith.constant 28 : index
    %75 = memref.load %arg3[%c28] : memref<32xf32, #tpu.memory_space<smem>>
    %76 = vector.broadcast %75 : f32 to vector<8x16xf32>
    %77 = arith.mulf %53, %76 : vector<8x16xf32>
    %c1_15 = arith.constant 1 : index
    %78 = arith.index_cast %1 : i32 to index
    %c0_16 = arith.constant 0 : index
    %79 = vector.load %arg7[%c1_15, %78, %c0_16] : memref<4x18x18xf32, #tpu.memory_space<vmem>>, vector<1x10x18xf32>
    %80 = vector.shape_cast %79 : vector<1x10x18xf32> to vector<10x18xf32>
    %c9 = arith.constant 9 : index
    %81 = memref.load %arg2[%c9] : memref<36xf32, #tpu.memory_space<smem>>
    %82 = vector.extract_strided_slice %80 {offsets = [0, 0], sizes = [8, 16], strides = [1, 1]} : vector<10x18xf32> to vector<8x16xf32>
    %83 = vector.broadcast %81 : f32 to vector<8x16xf32>
    %84 = arith.mulf %82, %83 : vector<8x16xf32>
    %c10 = arith.constant 10 : index
    %85 = memref.load %arg2[%c10] : memref<36xf32, #tpu.memory_space<smem>>
    %86 = vector.extract_strided_slice %80 {offsets = [0, 1], sizes = [8, 16], strides = [1, 1]} : vector<10x18xf32> to vector<8x16xf32>
    %87 = vector.broadcast %85 : f32 to vector<8x16xf32>
    %88 = arith.mulf %86, %87 : vector<8x16xf32>
    %89 = arith.addf %84, %88 : vector<8x16xf32>
    %c11 = arith.constant 11 : index
    %90 = memref.load %arg2[%c11] : memref<36xf32, #tpu.memory_space<smem>>
    %91 = vector.extract_strided_slice %80 {offsets = [0, 2], sizes = [8, 16], strides = [1, 1]} : vector<10x18xf32> to vector<8x16xf32>
    %92 = vector.broadcast %90 : f32 to vector<8x16xf32>
    %93 = arith.mulf %91, %92 : vector<8x16xf32>
    %94 = arith.addf %89, %93 : vector<8x16xf32>
    %c12_17 = arith.constant 12 : index
    %95 = memref.load %arg2[%c12_17] : memref<36xf32, #tpu.memory_space<smem>>
    %96 = vector.extract_strided_slice %80 {offsets = [1, 0], sizes = [8, 16], strides = [1, 1]} : vector<10x18xf32> to vector<8x16xf32>
    %97 = vector.broadcast %95 : f32 to vector<8x16xf32>
    %98 = arith.mulf %96, %97 : vector<8x16xf32>
    %99 = arith.addf %94, %98 : vector<8x16xf32>
    %c13 = arith.constant 13 : index
    %100 = memref.load %arg2[%c13] : memref<36xf32, #tpu.memory_space<smem>>
    %101 = vector.extract_strided_slice %80 {offsets = [1, 1], sizes = [8, 16], strides = [1, 1]} : vector<10x18xf32> to vector<8x16xf32>
    %102 = vector.broadcast %100 : f32 to vector<8x16xf32>
    %103 = arith.mulf %101, %102 : vector<8x16xf32>
    %104 = arith.addf %99, %103 : vector<8x16xf32>
    %c14 = arith.constant 14 : index
    %105 = memref.load %arg2[%c14] : memref<36xf32, #tpu.memory_space<smem>>
    %106 = vector.extract_strided_slice %80 {offsets = [1, 2], sizes = [8, 16], strides = [1, 1]} : vector<10x18xf32> to vector<8x16xf32>
    %107 = vector.broadcast %105 : f32 to vector<8x16xf32>
    %108 = arith.mulf %106, %107 : vector<8x16xf32>
    %109 = arith.addf %104, %108 : vector<8x16xf32>
    %c15 = arith.constant 15 : index
    %110 = memref.load %arg2[%c15] : memref<36xf32, #tpu.memory_space<smem>>
    %111 = vector.extract_strided_slice %80 {offsets = [2, 0], sizes = [8, 16], strides = [1, 1]} : vector<10x18xf32> to vector<8x16xf32>
    %112 = vector.broadcast %110 : f32 to vector<8x16xf32>
    %113 = arith.mulf %111, %112 : vector<8x16xf32>
    %114 = arith.addf %109, %113 : vector<8x16xf32>
    %c16_18 = arith.constant 16 : index
    %115 = memref.load %arg2[%c16_18] : memref<36xf32, #tpu.memory_space<smem>>
    %116 = vector.extract_strided_slice %80 {offsets = [2, 1], sizes = [8, 16], strides = [1, 1]} : vector<10x18xf32> to vector<8x16xf32>
    %117 = vector.broadcast %115 : f32 to vector<8x16xf32>
    %118 = arith.mulf %116, %117 : vector<8x16xf32>
    %119 = arith.addf %114, %118 : vector<8x16xf32>
    %c17 = arith.constant 17 : index
    %120 = memref.load %arg2[%c17] : memref<36xf32, #tpu.memory_space<smem>>
    %121 = vector.extract_strided_slice %80 {offsets = [2, 2], sizes = [8, 16], strides = [1, 1]} : vector<10x18xf32> to vector<8x16xf32>
    %122 = vector.broadcast %120 : f32 to vector<8x16xf32>
    %123 = arith.mulf %121, %122 : vector<8x16xf32>
    %124 = arith.addf %119, %123 : vector<8x16xf32>
    %c1_19 = arith.constant 1 : index
    %125 = memref.load %arg3[%c1_19] : memref<32xf32, #tpu.memory_space<smem>>
    %126 = vector.broadcast %125 : f32 to vector<8x16xf32>
    %127 = arith.mulf %124, %126 : vector<8x16xf32>
    %128 = arith.addf %56, %127 : vector<8x16xf32>
    %c5_20 = arith.constant 5 : index
    %129 = memref.load %arg3[%c5_20] : memref<32xf32, #tpu.memory_space<smem>>
    %130 = vector.broadcast %129 : f32 to vector<8x16xf32>
    %131 = arith.mulf %124, %130 : vector<8x16xf32>
    %132 = arith.addf %59, %131 : vector<8x16xf32>
    %c9_21 = arith.constant 9 : index
    %133 = memref.load %arg3[%c9_21] : memref<32xf32, #tpu.memory_space<smem>>
    %134 = vector.broadcast %133 : f32 to vector<8x16xf32>
    %135 = arith.mulf %124, %134 : vector<8x16xf32>
    %136 = arith.addf %62, %135 : vector<8x16xf32>
    %c13_22 = arith.constant 13 : index
    %137 = memref.load %arg3[%c13_22] : memref<32xf32, #tpu.memory_space<smem>>
    %138 = vector.broadcast %137 : f32 to vector<8x16xf32>
    %139 = arith.mulf %124, %138 : vector<8x16xf32>
    %140 = arith.addf %65, %139 : vector<8x16xf32>
    %c17_23 = arith.constant 17 : index
    %141 = memref.load %arg3[%c17_23] : memref<32xf32, #tpu.memory_space<smem>>
    %142 = vector.broadcast %141 : f32 to vector<8x16xf32>
    %143 = arith.mulf %124, %142 : vector<8x16xf32>
    %144 = arith.addf %68, %143 : vector<8x16xf32>
    %c21 = arith.constant 21 : index
    %145 = memref.load %arg3[%c21] : memref<32xf32, #tpu.memory_space<smem>>
    %146 = vector.broadcast %145 : f32 to vector<8x16xf32>
    %147 = arith.mulf %124, %146 : vector<8x16xf32>
    %148 = arith.addf %71, %147 : vector<8x16xf32>
    %c25 = arith.constant 25 : index
    %149 = memref.load %arg3[%c25] : memref<32xf32, #tpu.memory_space<smem>>
    %150 = vector.broadcast %149 : f32 to vector<8x16xf32>
    %151 = arith.mulf %124, %150 : vector<8x16xf32>
    %152 = arith.addf %74, %151 : vector<8x16xf32>
    %c29 = arith.constant 29 : index
    %153 = memref.load %arg3[%c29] : memref<32xf32, #tpu.memory_space<smem>>
    %154 = vector.broadcast %153 : f32 to vector<8x16xf32>
    %155 = arith.mulf %124, %154 : vector<8x16xf32>
    %156 = arith.addf %77, %155 : vector<8x16xf32>
    %c2_24 = arith.constant 2 : index
    %157 = arith.index_cast %1 : i32 to index
    %c0_25 = arith.constant 0 : index
    %158 = vector.load %arg7[%c2_24, %157, %c0_25] : memref<4x18x18xf32, #tpu.memory_space<vmem>>, vector<1x10x18xf32>
    %159 = vector.shape_cast %158 : vector<1x10x18xf32> to vector<10x18xf32>
    %c18 = arith.constant 18 : index
    %160 = memref.load %arg2[%c18] : memref<36xf32, #tpu.memory_space<smem>>
    %161 = vector.extract_strided_slice %159 {offsets = [0, 0], sizes = [8, 16], strides = [1, 1]} : vector<10x18xf32> to vector<8x16xf32>
    %162 = vector.broadcast %160 : f32 to vector<8x16xf32>
    %163 = arith.mulf %161, %162 : vector<8x16xf32>
    %c19 = arith.constant 19 : index
    %164 = memref.load %arg2[%c19] : memref<36xf32, #tpu.memory_space<smem>>
    %165 = vector.extract_strided_slice %159 {offsets = [0, 1], sizes = [8, 16], strides = [1, 1]} : vector<10x18xf32> to vector<8x16xf32>
    %166 = vector.broadcast %164 : f32 to vector<8x16xf32>
    %167 = arith.mulf %165, %166 : vector<8x16xf32>
    %168 = arith.addf %163, %167 : vector<8x16xf32>
    %c20_26 = arith.constant 20 : index
    %169 = memref.load %arg2[%c20_26] : memref<36xf32, #tpu.memory_space<smem>>
    %170 = vector.extract_strided_slice %159 {offsets = [0, 2], sizes = [8, 16], strides = [1, 1]} : vector<10x18xf32> to vector<8x16xf32>
    %171 = vector.broadcast %169 : f32 to vector<8x16xf32>
    %172 = arith.mulf %170, %171 : vector<8x16xf32>
    %173 = arith.addf %168, %172 : vector<8x16xf32>
    %c21_27 = arith.constant 21 : index
    %174 = memref.load %arg2[%c21_27] : memref<36xf32, #tpu.memory_space<smem>>
    %175 = vector.extract_strided_slice %159 {offsets = [1, 0], sizes = [8, 16], strides = [1, 1]} : vector<10x18xf32> to vector<8x16xf32>
    %176 = vector.broadcast %174 : f32 to vector<8x16xf32>
    %177 = arith.mulf %175, %176 : vector<8x16xf32>
    %178 = arith.addf %173, %177 : vector<8x16xf32>
    %c22 = arith.constant 22 : index
    %179 = memref.load %arg2[%c22] : memref<36xf32, #tpu.memory_space<smem>>
    %180 = vector.extract_strided_slice %159 {offsets = [1, 1], sizes = [8, 16], strides = [1, 1]} : vector<10x18xf32> to vector<8x16xf32>
    %181 = vector.broadcast %179 : f32 to vector<8x16xf32>
    %182 = arith.mulf %180, %181 : vector<8x16xf32>
    %183 = arith.addf %178, %182 : vector<8x16xf32>
    %c23 = arith.constant 23 : index
    %184 = memref.load %arg2[%c23] : memref<36xf32, #tpu.memory_space<smem>>
    %185 = vector.extract_strided_slice %159 {offsets = [1, 2], sizes = [8, 16], strides = [1, 1]} : vector<10x18xf32> to vector<8x16xf32>
    %186 = vector.broadcast %184 : f32 to vector<8x16xf32>
    %187 = arith.mulf %185, %186 : vector<8x16xf32>
    %188 = arith.addf %183, %187 : vector<8x16xf32>
    %c24_28 = arith.constant 24 : index
    %189 = memref.load %arg2[%c24_28] : memref<36xf32, #tpu.memory_space<smem>>
    %190 = vector.extract_strided_slice %159 {offsets = [2, 0], sizes = [8, 16], strides = [1, 1]} : vector<10x18xf32> to vector<8x16xf32>
    %191 = vector.broadcast %189 : f32 to vector<8x16xf32>
    %192 = arith.mulf %190, %191 : vector<8x16xf32>
    %193 = arith.addf %188, %192 : vector<8x16xf32>
    %c25_29 = arith.constant 25 : index
    %194 = memref.load %arg2[%c25_29] : memref<36xf32, #tpu.memory_space<smem>>
    %195 = vector.extract_strided_slice %159 {offsets = [2, 1], sizes = [8, 16], strides = [1, 1]} : vector<10x18xf32> to vector<8x16xf32>
    %196 = vector.broadcast %194 : f32 to vector<8x16xf32>
    %197 = arith.mulf %195, %196 : vector<8x16xf32>
    %198 = arith.addf %193, %197 : vector<8x16xf32>
    %c26 = arith.constant 26 : index
    %199 = memref.load %arg2[%c26] : memref<36xf32, #tpu.memory_space<smem>>
    %200 = vector.extract_strided_slice %159 {offsets = [2, 2], sizes = [8, 16], strides = [1, 1]} : vector<10x18xf32> to vector<8x16xf32>
    %201 = vector.broadcast %199 : f32 to vector<8x16xf32>
    %202 = arith.mulf %200, %201 : vector<8x16xf32>
    %203 = arith.addf %198, %202 : vector<8x16xf32>
    %c2_30 = arith.constant 2 : index
    %204 = memref.load %arg3[%c2_30] : memref<32xf32, #tpu.memory_space<smem>>
    %205 = vector.broadcast %204 : f32 to vector<8x16xf32>
    %206 = arith.mulf %203, %205 : vector<8x16xf32>
    %207 = arith.addf %128, %206 : vector<8x16xf32>
    %c6_31 = arith.constant 6 : index
    %208 = memref.load %arg3[%c6_31] : memref<32xf32, #tpu.memory_space<smem>>
    %209 = vector.broadcast %208 : f32 to vector<8x16xf32>
    %210 = arith.mulf %203, %209 : vector<8x16xf32>
    %211 = arith.addf %132, %210 : vector<8x16xf32>
    %c10_32 = arith.constant 10 : index
    %212 = memref.load %arg3[%c10_32] : memref<32xf32, #tpu.memory_space<smem>>
    %213 = vector.broadcast %212 : f32 to vector<8x16xf32>
    %214 = arith.mulf %203, %213 : vector<8x16xf32>
    %215 = arith.addf %136, %214 : vector<8x16xf32>
    %c14_33 = arith.constant 14 : index
    %216 = memref.load %arg3[%c14_33] : memref<32xf32, #tpu.memory_space<smem>>
    %217 = vector.broadcast %216 : f32 to vector<8x16xf32>
    %218 = arith.mulf %203, %217 : vector<8x16xf32>
    %219 = arith.addf %140, %218 : vector<8x16xf32>
    %c18_34 = arith.constant 18 : index
    %220 = memref.load %arg3[%c18_34] : memref<32xf32, #tpu.memory_space<smem>>
    %221 = vector.broadcast %220 : f32 to vector<8x16xf32>
    %222 = arith.mulf %203, %221 : vector<8x16xf32>
    %223 = arith.addf %144, %222 : vector<8x16xf32>
    %c22_35 = arith.constant 22 : index
    %224 = memref.load %arg3[%c22_35] : memref<32xf32, #tpu.memory_space<smem>>
    %225 = vector.broadcast %224 : f32 to vector<8x16xf32>
    %226 = arith.mulf %203, %225 : vector<8x16xf32>
    %227 = arith.addf %148, %226 : vector<8x16xf32>
    %c26_36 = arith.constant 26 : index
    %228 = memref.load %arg3[%c26_36] : memref<32xf32, #tpu.memory_space<smem>>
    %229 = vector.broadcast %228 : f32 to vector<8x16xf32>
    %230 = arith.mulf %203, %229 : vector<8x16xf32>
    %231 = arith.addf %152, %230 : vector<8x16xf32>
    %c30 = arith.constant 30 : index
    %232 = memref.load %arg3[%c30] : memref<32xf32, #tpu.memory_space<smem>>
    %233 = vector.broadcast %232 : f32 to vector<8x16xf32>
    %234 = arith.mulf %203, %233 : vector<8x16xf32>
    %235 = arith.addf %156, %234 : vector<8x16xf32>
    %c3_37 = arith.constant 3 : index
    %236 = arith.index_cast %1 : i32 to index
    %c0_38 = arith.constant 0 : index
    %237 = vector.load %arg7[%c3_37, %236, %c0_38] : memref<4x18x18xf32, #tpu.memory_space<vmem>>, vector<1x10x18xf32>
    %238 = vector.shape_cast %237 : vector<1x10x18xf32> to vector<10x18xf32>
    %c27 = arith.constant 27 : index
    %239 = memref.load %arg2[%c27] : memref<36xf32, #tpu.memory_space<smem>>
    %240 = vector.extract_strided_slice %238 {offsets = [0, 0], sizes = [8, 16], strides = [1, 1]} : vector<10x18xf32> to vector<8x16xf32>
    %241 = vector.broadcast %239 : f32 to vector<8x16xf32>
    %242 = arith.mulf %240, %241 : vector<8x16xf32>
    %c28_39 = arith.constant 28 : index
    %243 = memref.load %arg2[%c28_39] : memref<36xf32, #tpu.memory_space<smem>>
    %244 = vector.extract_strided_slice %238 {offsets = [0, 1], sizes = [8, 16], strides = [1, 1]} : vector<10x18xf32> to vector<8x16xf32>
    %245 = vector.broadcast %243 : f32 to vector<8x16xf32>
    %246 = arith.mulf %244, %245 : vector<8x16xf32>
    %247 = arith.addf %242, %246 : vector<8x16xf32>
    %c29_40 = arith.constant 29 : index
    %248 = memref.load %arg2[%c29_40] : memref<36xf32, #tpu.memory_space<smem>>
    %249 = vector.extract_strided_slice %238 {offsets = [0, 2], sizes = [8, 16], strides = [1, 1]} : vector<10x18xf32> to vector<8x16xf32>
    %250 = vector.broadcast %248 : f32 to vector<8x16xf32>
    %251 = arith.mulf %249, %250 : vector<8x16xf32>
    %252 = arith.addf %247, %251 : vector<8x16xf32>
    %c30_41 = arith.constant 30 : index
    %253 = memref.load %arg2[%c30_41] : memref<36xf32, #tpu.memory_space<smem>>
    %254 = vector.extract_strided_slice %238 {offsets = [1, 0], sizes = [8, 16], strides = [1, 1]} : vector<10x18xf32> to vector<8x16xf32>
    %255 = vector.broadcast %253 : f32 to vector<8x16xf32>
    %256 = arith.mulf %254, %255 : vector<8x16xf32>
    %257 = arith.addf %252, %256 : vector<8x16xf32>
    %c31 = arith.constant 31 : index
    %258 = memref.load %arg2[%c31] : memref<36xf32, #tpu.memory_space<smem>>
    %259 = vector.extract_strided_slice %238 {offsets = [1, 1], sizes = [8, 16], strides = [1, 1]} : vector<10x18xf32> to vector<8x16xf32>
    %260 = vector.broadcast %258 : f32 to vector<8x16xf32>
    %261 = arith.mulf %259, %260 : vector<8x16xf32>
    %262 = arith.addf %257, %261 : vector<8x16xf32>
    %c32 = arith.constant 32 : index
    %263 = memref.load %arg2[%c32] : memref<36xf32, #tpu.memory_space<smem>>
    %264 = vector.extract_strided_slice %238 {offsets = [1, 2], sizes = [8, 16], strides = [1, 1]} : vector<10x18xf32> to vector<8x16xf32>
    %265 = vector.broadcast %263 : f32 to vector<8x16xf32>
    %266 = arith.mulf %264, %265 : vector<8x16xf32>
    %267 = arith.addf %262, %266 : vector<8x16xf32>
    %c33 = arith.constant 33 : index
    %268 = memref.load %arg2[%c33] : memref<36xf32, #tpu.memory_space<smem>>
    %269 = vector.extract_strided_slice %238 {offsets = [2, 0], sizes = [8, 16], strides = [1, 1]} : vector<10x18xf32> to vector<8x16xf32>
    %270 = vector.broadcast %268 : f32 to vector<8x16xf32>
    %271 = arith.mulf %269, %270 : vector<8x16xf32>
    %272 = arith.addf %267, %271 : vector<8x16xf32>
    %c34 = arith.constant 34 : index
    %273 = memref.load %arg2[%c34] : memref<36xf32, #tpu.memory_space<smem>>
    %274 = vector.extract_strided_slice %238 {offsets = [2, 1], sizes = [8, 16], strides = [1, 1]} : vector<10x18xf32> to vector<8x16xf32>
    %275 = vector.broadcast %273 : f32 to vector<8x16xf32>
    %276 = arith.mulf %274, %275 : vector<8x16xf32>
    %277 = arith.addf %272, %276 : vector<8x16xf32>
    %c35 = arith.constant 35 : index
    %278 = memref.load %arg2[%c35] : memref<36xf32, #tpu.memory_space<smem>>
    %279 = vector.extract_strided_slice %238 {offsets = [2, 2], sizes = [8, 16], strides = [1, 1]} : vector<10x18xf32> to vector<8x16xf32>
    %280 = vector.broadcast %278 : f32 to vector<8x16xf32>
    %281 = arith.mulf %279, %280 : vector<8x16xf32>
    %282 = arith.addf %277, %281 : vector<8x16xf32>
    %c3_42 = arith.constant 3 : index
    %283 = memref.load %arg3[%c3_42] : memref<32xf32, #tpu.memory_space<smem>>
    %284 = vector.broadcast %283 : f32 to vector<8x16xf32>
    %285 = arith.mulf %282, %284 : vector<8x16xf32>
    %286 = arith.addf %207, %285 : vector<8x16xf32>
    %c7_43 = arith.constant 7 : index
    %287 = memref.load %arg3[%c7_43] : memref<32xf32, #tpu.memory_space<smem>>
    %288 = vector.broadcast %287 : f32 to vector<8x16xf32>
    %289 = arith.mulf %282, %288 : vector<8x16xf32>
    %290 = arith.addf %211, %289 : vector<8x16xf32>
    %c11_44 = arith.constant 11 : index
    %291 = memref.load %arg3[%c11_44] : memref<32xf32, #tpu.memory_space<smem>>
    %292 = vector.broadcast %291 : f32 to vector<8x16xf32>
    %293 = arith.mulf %282, %292 : vector<8x16xf32>
    %294 = arith.addf %215, %293 : vector<8x16xf32>
    %c15_45 = arith.constant 15 : index
    %295 = memref.load %arg3[%c15_45] : memref<32xf32, #tpu.memory_space<smem>>
    %296 = vector.broadcast %295 : f32 to vector<8x16xf32>
    %297 = arith.mulf %282, %296 : vector<8x16xf32>
    %298 = arith.addf %219, %297 : vector<8x16xf32>
    %c19_46 = arith.constant 19 : index
    %299 = memref.load %arg3[%c19_46] : memref<32xf32, #tpu.memory_space<smem>>
    %300 = vector.broadcast %299 : f32 to vector<8x16xf32>
    %301 = arith.mulf %282, %300 : vector<8x16xf32>
    %302 = arith.addf %223, %301 : vector<8x16xf32>
    %c23_47 = arith.constant 23 : index
    %303 = memref.load %arg3[%c23_47] : memref<32xf32, #tpu.memory_space<smem>>
    %304 = vector.broadcast %303 : f32 to vector<8x16xf32>
    %305 = arith.mulf %282, %304 : vector<8x16xf32>
    %306 = arith.addf %227, %305 : vector<8x16xf32>
    %c27_48 = arith.constant 27 : index
    %307 = memref.load %arg3[%c27_48] : memref<32xf32, #tpu.memory_space<smem>>
    %308 = vector.broadcast %307 : f32 to vector<8x16xf32>
    %309 = arith.mulf %282, %308 : vector<8x16xf32>
    %310 = arith.addf %231, %309 : vector<8x16xf32>
    %c31_49 = arith.constant 31 : index
    %311 = memref.load %arg3[%c31_49] : memref<32xf32, #tpu.memory_space<smem>>
    %312 = vector.broadcast %311 : f32 to vector<8x16xf32>
    %313 = arith.mulf %282, %312 : vector<8x16xf32>
    %314 = arith.addf %235, %313 : vector<8x16xf32>
    %c0_50 = arith.constant 0 : index
    %315 = memref.load %arg4[%c0_50] : memref<8xf32, #tpu.memory_space<smem>>
    %316 = vector.broadcast %315 : f32 to vector<8x16xf32>
    %317 = arith.addf %286, %316 : vector<8x16xf32>
    %c0_51 = arith.constant 0 : index
    %c0_52 = arith.constant 0 : index
    %c0_53 = arith.constant 0 : index
    %c0_54 = arith.constant 0 : index
    %318 = vector.load %arg6[%c0_51, %c0_52, %c0_53, %c0_54] : memref<1x8x8x16xf32, #tpu.memory_space<vmem>>, vector<1x1x8x16xf32>
    %319 = vector.shape_cast %318 : vector<1x1x8x16xf32> to vector<8x16xf32>
    %320 = vector.shape_cast %317 : vector<8x16xf32> to vector<1x1x8x16xf32>
    tpu.vector_store %arg6[%c0_51, %c0_52, %c0_53, %c0_54], %320 {strides = array<i32>} : memref<1x8x8x16xf32, #tpu.memory_space<vmem>>, vector<1x1x8x16xf32>,
    %c1_55 = arith.constant 1 : index
    %321 = memref.load %arg4[%c1_55] : memref<8xf32, #tpu.memory_space<smem>>
    %322 = vector.broadcast %321 : f32 to vector<8x16xf32>
    %323 = arith.addf %290, %322 : vector<8x16xf32>
    %c0_56 = arith.constant 0 : index
    %c1_57 = arith.constant 1 : index
    %c0_58 = arith.constant 0 : index
    %c0_59 = arith.constant 0 : index
    %324 = vector.load %arg6[%c0_56, %c1_57, %c0_58, %c0_59] : memref<1x8x8x16xf32, #tpu.memory_space<vmem>>, vector<1x1x8x16xf32>
    %325 = vector.shape_cast %324 : vector<1x1x8x16xf32> to vector<8x16xf32>
    %326 = vector.shape_cast %323 : vector<8x16xf32> to vector<1x1x8x16xf32>
    tpu.vector_store %arg6[%c0_56, %c1_57, %c0_58, %c0_59], %326 {strides = array<i32>} : memref<1x8x8x16xf32, #tpu.memory_space<vmem>>, vector<1x1x8x16xf32>,
    %c2_60 = arith.constant 2 : index
    %327 = memref.load %arg4[%c2_60] : memref<8xf32, #tpu.memory_space<smem>>
    %328 = vector.broadcast %327 : f32 to vector<8x16xf32>
    %329 = arith.addf %294, %328 : vector<8x16xf32>
    %c0_61 = arith.constant 0 : index
    %c2_62 = arith.constant 2 : index
    %c0_63 = arith.constant 0 : index
    %c0_64 = arith.constant 0 : index
    %330 = vector.load %arg6[%c0_61, %c2_62, %c0_63, %c0_64] : memref<1x8x8x16xf32, #tpu.memory_space<vmem>>, vector<1x1x8x16xf32>
    %331 = vector.shape_cast %330 : vector<1x1x8x16xf32> to vector<8x16xf32>
    %332 = vector.shape_cast %329 : vector<8x16xf32> to vector<1x1x8x16xf32>
    tpu.vector_store %arg6[%c0_61, %c2_62, %c0_63, %c0_64], %332 {strides = array<i32>} : memref<1x8x8x16xf32, #tpu.memory_space<vmem>>, vector<1x1x8x16xf32>,
    %c3_65 = arith.constant 3 : index
    %333 = memref.load %arg4[%c3_65] : memref<8xf32, #tpu.memory_space<smem>>
    %334 = vector.broadcast %333 : f32 to vector<8x16xf32>
    %335 = arith.addf %298, %334 : vector<8x16xf32>
    %c0_66 = arith.constant 0 : index
    %c3_67 = arith.constant 3 : index
    %c0_68 = arith.constant 0 : index
    %c0_69 = arith.constant 0 : index
    %336 = vector.load %arg6[%c0_66, %c3_67, %c0_68, %c0_69] : memref<1x8x8x16xf32, #tpu.memory_space<vmem>>, vector<1x1x8x16xf32>
    %337 = vector.shape_cast %336 : vector<1x1x8x16xf32> to vector<8x16xf32>
    %338 = vector.shape_cast %335 : vector<8x16xf32> to vector<1x1x8x16xf32>
    tpu.vector_store %arg6[%c0_66, %c3_67, %c0_68, %c0_69], %338 {strides = array<i32>} : memref<1x8x8x16xf32, #tpu.memory_space<vmem>>, vector<1x1x8x16xf32>,
    %c4_70 = arith.constant 4 : index
    %339 = memref.load %arg4[%c4_70] : memref<8xf32, #tpu.memory_space<smem>>
    %340 = vector.broadcast %339 : f32 to vector<8x16xf32>
    %341 = arith.addf %302, %340 : vector<8x16xf32>
    %c0_71 = arith.constant 0 : index
    %c4_72 = arith.constant 4 : index
    %c0_73 = arith.constant 0 : index
    %c0_74 = arith.constant 0 : index
    %342 = vector.load %arg6[%c0_71, %c4_72, %c0_73, %c0_74] : memref<1x8x8x16xf32, #tpu.memory_space<vmem>>, vector<1x1x8x16xf32>
    %343 = vector.shape_cast %342 : vector<1x1x8x16xf32> to vector<8x16xf32>
    %344 = vector.shape_cast %341 : vector<8x16xf32> to vector<1x1x8x16xf32>
    tpu.vector_store %arg6[%c0_71, %c4_72, %c0_73, %c0_74], %344 {strides = array<i32>} : memref<1x8x8x16xf32, #tpu.memory_space<vmem>>, vector<1x1x8x16xf32>,
    %c5_75 = arith.constant 5 : index
    %345 = memref.load %arg4[%c5_75] : memref<8xf32, #tpu.memory_space<smem>>
    %346 = vector.broadcast %345 : f32 to vector<8x16xf32>
    %347 = arith.addf %306, %346 : vector<8x16xf32>
    %c0_76 = arith.constant 0 : index
    %c5_77 = arith.constant 5 : index
    %c0_78 = arith.constant 0 : index
    %c0_79 = arith.constant 0 : index
    %348 = vector.load %arg6[%c0_76, %c5_77, %c0_78, %c0_79] : memref<1x8x8x16xf32, #tpu.memory_space<vmem>>, vector<1x1x8x16xf32>
    %349 = vector.shape_cast %348 : vector<1x1x8x16xf32> to vector<8x16xf32>
    %350 = vector.shape_cast %347 : vector<8x16xf32> to vector<1x1x8x16xf32>
    tpu.vector_store %arg6[%c0_76, %c5_77, %c0_78, %c0_79], %350 {strides = array<i32>} : memref<1x8x8x16xf32, #tpu.memory_space<vmem>>, vector<1x1x8x16xf32>,
    %c6_80 = arith.constant 6 : index
    %351 = memref.load %arg4[%c6_80] : memref<8xf32, #tpu.memory_space<smem>>
    %352 = vector.broadcast %351 : f32 to vector<8x16xf32>
    %353 = arith.addf %310, %352 : vector<8x16xf32>
    %c0_81 = arith.constant 0 : index
    %c6_82 = arith.constant 6 : index
    %c0_83 = arith.constant 0 : index
    %c0_84 = arith.constant 0 : index
    %354 = vector.load %arg6[%c0_81, %c6_82, %c0_83, %c0_84] : memref<1x8x8x16xf32, #tpu.memory_space<vmem>>, vector<1x1x8x16xf32>
    %355 = vector.shape_cast %354 : vector<1x1x8x16xf32> to vector<8x16xf32>
    %356 = vector.shape_cast %353 : vector<8x16xf32> to vector<1x1x8x16xf32>
    tpu.vector_store %arg6[%c0_81, %c6_82, %c0_83, %c0_84], %356 {strides = array<i32>} : memref<1x8x8x16xf32, #tpu.memory_space<vmem>>, vector<1x1x8x16xf32>,
    %c7_85 = arith.constant 7 : index
    %357 = memref.load %arg4[%c7_85] : memref<8xf32, #tpu.memory_space<smem>>
    %358 = vector.broadcast %357 : f32 to vector<8x16xf32>
    %359 = arith.addf %314, %358 : vector<8x16xf32>
    %c0_86 = arith.constant 0 : index
    %c7_87 = arith.constant 7 : index
    %c0_88 = arith.constant 0 : index
    %c0_89 = arith.constant 0 : index
    %360 = vector.load %arg6[%c0_86, %c7_87, %c0_88, %c0_89] : memref<1x8x8x16xf32, #tpu.memory_space<vmem>>, vector<1x1x8x16xf32>
    %361 = vector.shape_cast %360 : vector<1x1x8x16xf32> to vector<8x16xf32>
    %362 = vector.shape_cast %359 : vector<8x16xf32> to vector<1x1x8x16xf32>
    tpu.vector_store %arg6[%c0_86, %c7_87, %c0_88, %c0_89], %362 {strides = array<i32>} : memref<1x8x8x16xf32, #tpu.memory_space<vmem>>, vector<1x1x8x16xf32>,
    return
  }
  func.func @transform_0(%arg0: i32, %arg1: i32) -> i32 {
    %c0_i32 = arith.constant 0 : i32
    %c0_i32_0 = arith.constant 0 : i32
    return %c0_i32 : i32
  }
  func.func @transform_1(%arg0: i32, %arg1: i32) -> i32 {
    %c0_i32 = arith.constant 0 : i32
    %c0_i32_0 = arith.constant 0 : i32
    return %c0_i32 : i32
  }
  func.func @transform_2(%arg0: i32, %arg1: i32) -> i32 {
    %c0_i32 = arith.constant 0 : i32
    %c0_i32_0 = arith.constant 0 : i32
    return %c0_i32 : i32
  }
  func.func @transform_3(%arg0: i32, %arg1: i32) -> (i32, i32, i32, i32) {
    %c0_i32 = arith.constant 0 : i32
    %c0_i32_0 = arith.constant 0 : i32
    %c0_i32_1 = arith.constant 0 : i32
    %c0_i32_2 = arith.constant 0 : i32
    return %arg0, %c0_i32, %c0_i32_0, %c0_i32_1 : i32, i32, i32, i32
  }
  func.func @transform_4(%arg0: i32, %arg1: i32) -> (i32, i32, i32, i32) {
    %c0_i32 = arith.constant 0 : i32
    %c0_i32_0 = arith.constant 0 : i32
    %c0_i32_1 = arith.constant 0 : i32
    return %arg0, %c0_i32, %arg1, %c0_i32_0 : i32, i32, i32, i32
  }
}

</mosaic_0001>

<bundles_post_ra>
// kernel: squeeze.5
= control target key start
LH: loop header
LB: loop body
LE: loop exit
PB: predicated region body
PF: predicated region fallthrough
CT: control target
= control target key end

     0   :  { %s67_s10 = smov 28   ;;  %s68_s11 = smov 20   ;;  %vm3_vm0 = vcmask 31744   ;;  %vm9_vm1 = vcmask 261344   ;;  %vm15_vm2 = vcmask 228544   ;;  %vm21_vm3 = vcmask 195744   ;;  %s111_s0 = inlined_call_operand.vmem [shape: f32[8,4,1,1], index: 0, kind: input, shape index: {}]   ;;  %s112_s1 = inlined_call_operand.vmem [shape: f32[32], index: 1, kind: output, shape index: {}]  }
   0x1   :  { %v53_v0 = vld [vmem:[%s111_s0 + $0x7] sm:$0x1]   ;;  %v55_v1 = vld [vmem:[%s111_s0 + $0x5] sm:$0x1]   ;;  %v54_v2 = vld [vmem:[%s111_s0 + $0x6] sm:$0x1]  }
   0x2   :  { %7 = vrot.lane.b32.xlu0 %v53_v0, %s67_s10  ;;  %19 = vrot.lane.b32.xlu1 %v55_v1, %s68_s11  ;;  %v56_v3 = vld [vmem:[%s111_s0 + $0x4] sm:$0x1]   ;;  %v2_v4 = vld [vmem:[%s111_s0] sm:$0x1]   ;;  %s69_s18 = smov 24   ;;  %s70_s19 = smov 16  }
   0x3   :  { %4 = vst.msk [vmem:[#allocation0] sm:$0x1] %vm3_vm0, %v2_v4   ;;  %v57_v5 = vld [vmem:[%s111_s0 + $0x3] sm:$0x1]   ;;  %v58_v6 = vld [vmem:[%s111_s0 + $0x2] sm:$0x1]  }
   0x4   :  { %s71_s24 = smov 12   ;;  %s72_s25 = smov 8   ;;  %v59_v7 = vld [vmem:[%s111_s0 + $0x1] sm:$0x1]   ;;  %vm27_vm4 = vcmask 162944   ;;  %vm33_vm5 = vcmask 130144  }
   0x5   :  { %s73_s0 = smov 4   ;;  %vm39_vm6 = vcmask 97344   ;;  %vm45_vm7 = vcmask 64544  }
   0x6   :  { %13 = vrot.lane.b32.xlu0 %v54_v2, %s69_s18  ;;  %25 = vrot.lane.b32.xlu1 %v56_v3, %s70_s19 }
   0xa   :  { %31 = vrot.lane.b32.xlu0 %v57_v5, %s71_s24  ;;  %37 = vrot.lane.b32.xlu1 %v58_v6, %s72_s25 }
   0xe   :  { %43 = vrot.lane.b32.xlu0 %v59_v7, %s73_s0 }
  0x74   :  { %v8_v8 = vpop.permute.xlu0 %7   ;;  %v20_v9 = vpop.permute.xlu1 %19  }
  0x75   :  { %10 = vst.msk [vmem:[#allocation0] sm:$0x1] %vm9_vm1, %v8_v8  }
  0x78   :  { %v14_v10 = vpop.permute.xlu0 %13   ;;  %v26_v11 = vpop.permute.xlu1 %25  }
  0x79   :  { %16 = vst.msk [vmem:[#allocation0] sm:$0x1] %vm15_vm2, %v14_v10  }
  0x7a   :  { %22 = vst.msk [vmem:[#allocation0] sm:$0x1] %vm21_vm3, %v20_v9  }
  0x7b   :  { %28 = vst.msk [vmem:[#allocation0] sm:$0x1] %vm27_vm4, %v26_v11  }
  0x7c   :  { %v32_v12 = vpop.permute.xlu0 %31   ;;  %v38_v13 = vpop.permute.xlu1 %37  }
  0x7d   :  { %34 = vst.msk [vmem:[#allocation0] sm:$0x1] %vm33_vm5, %v32_v12  }
  0x7e   :  { %40 = vst.msk [vmem:[#allocation0] sm:$0x1] %vm39_vm6, %v38_v13  }
  0x80   :  { %v44_v14 = vpop.permute.xlu0 %43  }
  0x81   :  { %46 = vst.msk [vmem:[#allocation0] sm:$0x1] %vm45_vm7, %v44_v14  }
  0x88   :  { %v50_v15 = vld [vmem:[#allocation0] sm:$0x1] }
  0x89   :  { %52 = vst [vmem:[%s112_s1] sm:$0x1] %v50_v15 }

// kernel: squeeze.4
= control target key start
LH: loop header
LB: loop body
LE: loop exit
PB: predicated region body
PF: predicated region fallthrough
CT: control target
= control target key end

     0   :  { %s112_s14 = smov 27   ;;  %vm21_vm0 = vcmask 23552   ;;  %s113_s15 = smov 30   ;;  %vm27_vm1 = vcmask 294152   ;;  %vm33_vm2 = vcmask 269552   ;;  %vm39_vm3 = vcmask 244952   ;;  %s147_s0 = inlined_call_operand.vmem [shape: f32[4,1,3,3], index: 0, kind: input, shape index: {}]   ;;  %s148_s1 = inlined_call_operand.vmem [shape: f32[36], index: 1, kind: output, shape index: {}]  }
   0x1   :  { %v97_v0 = vld [vmem:[%s147_s0 + $0xc] sm:$0xf]  ;;  %v98_v1 = vld [vmem:[%s147_s0 + $0x8] sm:$0xf]  ;;  %v99_v2 = vld [vmem:[%s147_s0 + $0x4] sm:$0xf] }
   0x2   :  { %8 = vst [vmem:[#allocation1 + $0x18] sm:$0xf] %v97_v0  ;;  %13 = vst [vmem:[#allocation1 + $0x10] sm:$0xf] %v98_v1  ;;  %v18_v3 = vld [vmem:[%s147_s0] sm:$0xf] }
   0x3   :  { %17 = vst [vmem:[#allocation1 + $0x8] sm:$0xf] %v99_v2  ;;  %19 = vst [vmem:[#allocation1] sm:$0xf] %v18_v3  ;;  %s111_s0 = smov 33   ;;  %s114_s16 = smov 24  }
   0x4   :  { %s115_s17 = smov 21   ;;  %s116_s18 = smov 18   ;;  %vm45_vm4 = vcmask 220352   ;;  %vm51_vm5 = vcmask 195752   ;;  %vm57_vm6 = vcmask 171152   ;;  %vm63_vm7 = vcmask 146552  }
   0x5   :  { %s117_s19 = smov 15   ;;  %s118_s20 = smov 12   ;;  %vm69_vm8 = vcmask 121952   ;;  %vm75_vm9 = vcmask 97352   ;;  %vm81_vm10 = vcmask 72752   ;;  %vm87_vm11 = vcmask 48152  }
   0x6   :  { %s119_s21 = smov 9   ;;  %s120_s22 = smov 6  }
   0x7   :  { %s121_s23 = smov 3  }
   0x9   :  { %v24_v4 = vld [vmem:[#allocation1 + $0x1a] sm:$0x1]   ;;  %v36_v5 = vld [vmem:[#allocation1 + $0x18] sm:$0x1]   ;;  %v30_v6 = vld [vmem:[#allocation1 + $0x19] sm:$0x1]  }
   0xa   :  { %25 = vrot.lane.b32.xlu0 %v24_v4, %s111_s0  ;;  %37 = vrot.lane.b32.xlu1 %v36_v5, %s112_s14  ;;  %v42_v7 = vld [vmem:[#allocation1 + $0x12] sm:$0x1]   ;;  %v20_v8 = vld [vmem:[#allocation1] sm:$0x1]   ;;  %v48_v9 = vld [vmem:[#allocation1 + $0x11] sm:$0x1]  }
   0xb   :  { %22 = vst.msk [vmem:[#allocation0] sm:$0x1] %vm21_vm0, %v20_v8   ;;  %v54_v10 = vld [vmem:[#allocation1 + $0x10] sm:$0x1]   ;;  %v60_v11 = vld [vmem:[#allocation1 + $0xa] sm:$0x1]  }
   0xc   :  { %v66_v12 = vld [vmem:[#allocation1 + $0x9] sm:$0x1]   ;;  %v72_v13 = vld [vmem:[#allocation1 + $0x8] sm:$0x1]   ;;  %v78_v14 = vld [vmem:[#allocation1 + $0x2] sm:$0x1]  }
   0xd   :  { %v84_v15 = vld [vmem:[#allocation1 + $0x1] sm:$0x1]  }
   0xe   :  { %31 = vrot.lane.b32.xlu0 %v30_v6, %s113_s15  ;;  %43 = vrot.lane.b32.xlu1 %v42_v7, %s114_s16 }
  0x12   :  { %49 = vrot.lane.b32.xlu0 %v48_v9, %s115_s17  ;;  %55 = vrot.lane.b32.xlu1 %v54_v10, %s116_s18 }
  0x16   :  { %61 = vrot.lane.b32.xlu0 %v60_v11, %s117_s19  ;;  %67 = vrot.lane.b32.xlu1 %v66_v12, %s118_s20 }
  0x1a   :  { %73 = vrot.lane.b32.xlu0 %v72_v13, %s119_s21  ;;  %79 = vrot.lane.b32.xlu1 %v78_v14, %s120_s22 }
  0x1e   :  { %85 = vrot.lane.b32.xlu0 %v84_v15, %s121_s23 }
  0x7c   :  { %v26_v16 = vpop.permute.xlu0 %25   ;;  %v38_v17 = vpop.permute.xlu1 %37  }
  0x7d   :  { %28 = vst.msk [vmem:[#allocation0] sm:$0x1] %vm27_vm1, %v26_v16  }
  0x80   :  { %v32_v18 = vpop.permute.xlu0 %31   ;;  %v44_v19 = vpop.permute.xlu1 %43  }
  0x81   :  { %34 = vst.msk [vmem:[#allocation0] sm:$0x1] %vm33_vm2, %v32_v18  }
  0x82   :  { %40 = vst.msk [vmem:[#allocation0] sm:$0x1] %vm39_vm3, %v38_v17  }
  0x83   :  { %46 = vst.msk [vmem:[#allocation0] sm:$0x1] %vm45_vm4, %v44_v19  }
  0x84   :  { %v50_v20 = vpop.permute.xlu0 %49   ;;  %v56_v21 = vpop.permute.xlu1 %55  }
  0x85   :  { %52 = vst.msk [vmem:[#allocation0] sm:$0x1] %vm51_vm5, %v50_v20  }
  0x86   :  { %58 = vst.msk [vmem:[#allocation0] sm:$0x1] %vm57_vm6, %v56_v21  }
  0x88   :  { %v62_v22 = vpop.permute.xlu0 %61   ;;  %v68_v23 = vpop.permute.xlu1 %67  }
  0x89   :  { %64 = vst.msk [vmem:[#allocation0] sm:$0x1] %vm63_vm7, %v62_v22  }
  0x8a   :  { %70 = vst.msk [vmem:[#allocation0] sm:$0x1] %vm69_vm8, %v68_v23  }
  0x8c   :  { %v74_v24 = vpop.permute.xlu0 %73   ;;  %v80_v25 = vpop.permute.xlu1 %79  }
  0x8d   :  { %76 = vst.msk [vmem:[#allocation0] sm:$0x1] %vm75_vm9, %v74_v24  }
  0x8e   :  { %82 = vst.msk [vmem:[#allocation0] sm:$0x1] %vm81_vm10, %v80_v25  }
  0x90   :  { %v86_v26 = vpop.permute.xlu0 %85  }
  0x91   :  { %88 = vst.msk [vmem:[#allocation0] sm:$0x1] %vm87_vm11, %v86_v26  }
  0x98   :  { %v92_v27 = vld [vmem:[#allocation0] sm:$0x1] }
  0x99   :  { %94 = vst [vmem:[%s148_s1] sm:$0x1] %v92_v27 }

// kernel: sepconv2d.1
= control target key start
LH: loop header
LB: loop body
LE: loop exit
PB: predicated region body
PF: predicated region fallthrough
CT: control target
= control target key end

     0   :  { %s2284_s0 = inlined_call_operand.vmem [shape: f32[36], index: 0, kind: input, shape index: {}]   ;;  %s2285_s1 = inlined_call_operand.vmem [shape: f32[32], index: 1, kind: input, shape index: {}]   ;;  %s2286_s2 = inlined_call_operand.vmem [shape: f32[8], index: 2, kind: input, shape index: {}]   ;;  %s2287_s3 = inlined_call_operand.hbm [shape: f32[2,4,16,16], index: 3, kind: input, shape index: {}]   ;;  %s2288_s4 = inlined_call_operand.hbm [shape: f32[2,8,16,16], index: 4, kind: output, shape index: {}]  }
   0x1   :  { %2308 = sst [smem:[#allocation29_spill]] %s2284_s0 }
   0x2   :  { %2309 = sst [smem:[#allocation30_spill]] %s2285_s1 }
   0x3   :  { %2310 = sst [smem:[#allocation31_spill]] %s2286_s2 }
   0x4   :  { %2311 = sst [smem:[#allocation32_spill]] %s2287_s3 }
   0x5   :  { %2312 = sst [smem:[#allocation33_spill]] %s2288_s4 }
   0x6   :  { %9 = vsyncpa [#allocation6], 0 }
   0x7   :  { %10 = vsyncpa [#allocation8], 0 }
   0x8   :  { %11 = vsyncpa [#allocation4], 0 }
   0x9   :  { %13 = vsyncpa [#allocation4 + $0x1], 0 }
   0xa   :  { %14 = vsyncpa [#allocation5], 0 }
   0xb   :  { %16 = vsyncpa [#allocation5 + $0x1], 0  ;;  %s1525_s15 = smov 0   ;;  %s1527_s16 = smov 0  }
   0xc   :  { %s1529_s17 = smov 0   ;;  %s1531_s18 = smov 0  }
   0xd   :  { %s1533_s19 = smov 0   ;;  %s1535_s20 = smov 0  }
   0xe   :  { %s1537_s21 = smov 0   ;;  %s1539_s22 = smov 0  }
   0xf   :  { %s1541_s23 = smov 0   ;;  %s1543_s24 = smov 0  }
  0x10   :  { %s1545_s25 = smov 0  }
  0x11 LB: > { %2313 = sst [smem:[#allocation16_spill]] %s1444_s15  ;;  %s1025_s26 = sadd.s32 4294967295, %s1484_s25   ;;  %s1484_s25 = sphi %s1545_s25, %s22_s25   ;;  %s1480_s24 = sphi %s1543_s24, %s2358_s24   ;;  %s1476_s23 = sphi %s1541_s23, %s2357_s23   ;;  %s1472_s22 = sphi %s1539_s22, %s2356_s22   ;;  %s1468_s21 = sphi %s1537_s21, %s2355_s21   ;;  %s1464_s20 = sphi %s1535_s20, %s2354_s20   ;;  %s1460_s19 = sphi %s1533_s19, %s2353_s19   ;;  %s1456_s18 = sphi %s1531_s18, %s2352_s18   ;;  %s1452_s17 = sphi %s1529_s17, %s2351_s17   ;;  %s1448_s16 = sphi %s1527_s16, %s2360_s16   ;;  %s1444_s15 = sphi %s1525_s15, %s2359_s15  }
  0x12   : > { %2314 = sst [smem:[#allocation17_spill]] %s1452_s17  ;;  %s1026_s27 = sadd.s32 4294967294, %s1484_s25  }
  0x13   : > { %2315 = sst [smem:[#allocation18_spill]] %s1460_s19  ;;  %p117_p0 = scmp.ne.s32.totalorder %s1460_s19, %s1456_s18 }
  0x14   : > { %2316 = sst [smem:[#allocation19_spill]] %s1464_s20  ;;  %p1581_p1 = scmp.eq.s32.totalorder %s1025_s26, 0 }
  0x15   : > { %2317 = sst [smem:[#allocation20_spill]] %s1476_s23  ;;  %p142_p2 = scmp.ne.s32.totalorder %s1452_s17, %s1448_s16 }
  0x16   : > { %2318 = sst [smem:[#allocation21_spill]] %s1480_s24  ;;  %p1590_p3 = por %p1581_p1, %p117_p0 }
  0x17   : > { %2319 = sst [smem:[#allocation22_spill]] %s1484_s25  ;;  %p143_p4 = scmp.eq.s32.totalorder %s1025_s26, 3 }
  0x18   : > { %s2320_s28 = scalar_select %p1581_p1, 1, 0 }
  0x19   : > { %s2321_s30 = scalar_select %p1590_p3, 1, 0 }
  0x1a   : > { %p148_p5 = scmp.ne.s32.totalorder %s1448_s16, %s1444_s15  ;;  %p149_p6 = scmp.eq.s32.totalorder %s1026_s27, 3 }
  0x1b   : > { %p1596_p7 = por %p143_p4, %p142_p2  ;;  %p1027_p8 = scmp.ge.s32.totalorder %s1484_s25, 1 }
  0x1c   : > { %p1601_p9 = por %p149_p6, %p148_p5  ;;  %p156_p10 = scmp.lt.s32.totalorder %s1484_s25, 5 }
  0x1d   : > { %s2322_s5 = scalar_select %p1596_p7, 1, 0 }
  0x1e   : > { %s2324_s6 = scalar_select %p1601_p9, 1, 0 }
  0x1f   : > { %2323 = sst [smem:[#allocation23_spill]] %s2322_s5  ;;  %s2326_s1 = sld [smem:[#allocation30_spill]] }
  0x20   : > { %2325 = sst [smem:[#allocation24_spill]] %s2324_s6  ;;  %p1609_p11 = pnand %p1027_p8, %p156_p10 }
  0x21   : > { %s2329_s0 = sld [smem:[#allocation29_spill]] }
  0x22   : > { %s2327_s10 = scalar_select %p1609_p11, 1, 0 }
  0x23   : > { %p1153_p12 = pneg %p1609_p11 }
  0x25   : > { %s180_s9 = sshll.u32 %s2326_s1, 4  ;;  %p1617_p13 = pnand %p1153_p12, %p1581_p1  ;;  %s181_s9 = int_to_ptr.vmem [resolvable:$true] %s180_s9 }
  0x26   : > { %s1279_s18 = scalar_lea.vmem %s181_s9, 16  ;;  %p1287_p6 = scmp.lt.s32.totalorder %s181_s9, %s181_s9 }
  0x27   : > { %s169_s14 = sshll.u32 %s2329_s0, 4  ;;  %p1280_p0 = scmp.ne.s32.totalorder %s181_s9, %s1279_s18  ;;  %s170_s14 = int_to_ptr.vmem [resolvable:$true] %s169_s14 }
  0x28   : > { %p1281_p2 = pneg %p1617_p13  ;;  %p1288_p8 = scmp.lt.s32.totalorder %s1279_s18, %s1279_s18 }
  0x2a   : > { %p1282_p4 = pnand %p1281_p2, %p1280_p0  ;;  %p1289_p10 = por %p1288_p8, %p1287_p6 }
  0x2c   : > { %p1283_p5 = pneg %p1282_p4 }
  0x2e   : > { %p1290_p12 = pnand %p1289_p10, %p1283_p5 }
  0x30   : > { %1293 = shalt.err (!%p1290_p12)
}
  0x31   : > { %s1486_s26 = smov [#allocation7]   ;;  %s1294_s27 = scalar_lea.vmem %s170_s14, 16 }
  0x32   : > { %1159 = dma.vmem_to_smem (!%p1617_p13), %s181_s9, 16, %s1486_s26, [#allocation8]  }
  0x33   : > { %p1295_p9 = scmp.ne.s32.totalorder %s170_s14, %s1294_s27  ;;  %p1302_p1 = scmp.lt.s32.totalorder %s170_s14, %s170_s14 }
  0x34   : > { %p1303_p11 = scmp.lt.s32.totalorder %s1294_s27, %s1294_s27 }
  0x35   : > { %p1297_p7 = pnand %p1295_p9, %p1281_p2 }
  0x36   : > { %p1304_p0 = por %p1303_p11, %p1302_p1 }
  0x37   : > { %p1298_p3 = pneg %p1297_p7 }
  0x39   : > { %p1305_p4 = pnand %p1304_p0, %p1298_p3 }
  0x3b   : > { %1308 = shalt.err (!%p1305_p4)
}
  0x3c   : > { %s1487_s7 = smov [#allocation3]   ;;  %s2330_s2 = sld [smem:[#allocation31_spill]] }
  0x3d   : > { %1156 = dma.vmem_to_smem (!%p1617_p13), %s170_s14, 16, %s1487_s7, [#allocation6]  }
  0x42   : > { %s191_s9 = sshll.u32 %s2330_s2, 4  ;;  %s192_s9 = int_to_ptr.vmem [resolvable:$true] %s191_s9 }
  0x43   : > { %s1309_s13 = scalar_lea.vmem %s192_s9, 16  ;;  %p1317_p6 = scmp.lt.s32.totalorder %s192_s9, %s192_s9 }
  0x44   : > { %p1310_p5 = scmp.ne.s32.totalorder %s192_s9, %s1309_s13  ;;  %p1318_p1 = scmp.lt.s32.totalorder %s1309_s13, %s1309_s13 }
  0x46   : > { %p1312_p7 = pnand %p1310_p5, %p1281_p2  ;;  %p1319_p3 = por %p1318_p1, %p1317_p6 }
  0x48   : > { %p1313_p9 = pneg %p1312_p7 }
  0x4a   : > { %p1320_p11 = pnand %p1319_p3, %p1313_p9 }
  0x4c   : > { %1323 = shalt.err (!%p1320_p11)
}
  0x4d   : > { %s1488_s18 = smov [#allocation9]   ;;  %s31_s14 = sadd.s32 1, %s1476_s23 }
  0x4e   : > { %1162 = dma.vmem_to_smem (!%p1617_p13), %s192_s9, 16, %s1488_s18, [#allocation8]  }
  0x4f   : > { %p32_p2 = scmp.ge.s32.totalorder %s31_s14, 2  ;;  %s34_s26 = sadd.s32 1, %s1480_s24 }
  0x50   : > { %s104_s27 = sadd.s32 1, %s1464_s20  ;;  %p111_p8 = scmp.ne.s32.totalorder %s1464_s20, %s1460_s19 }
  0x51   : > { %s2362_s14 = smov (%p32_p2, %s31_s14), 0  ;;  %s2364_s26 = smov (!%p32_p2, %s34_s26), %s1480_s24 }
  0x52   : > { %2331 = sst [smem:[#allocation25_spill]] %s2362_s14  ;;  %p112_p10 = scmp.eq.s32.totalorder %s1484_s25, 0 }
  0x53   : > { %s128_s11 = ssub.s32 %s1476_s23, %s2362_s14  ;;  %p36_p12 = scmp.ge.s32.totalorder %s2364_s26, 2 }
  0x54   : > { %p1174_p0 = scmp.lt.s32.totalorder %s1484_s25, 4  ;;  %p1656_p13 = por %p112_p10, %p111_p8 }
  0x55   : > { %s202_s8 = sand.u32 1, %s1464_s20   ;;  %s2366_s26 = smov (%p36_p12, %s2364_s26), 0 }
  0x56   : > { %2333 = sst [smem:[#allocation26_spill]] %s2366_s26  ;;  %s1032_s12 = sshll.u32 %s202_s8, 6 }
  0x57   : > { %s101_s9 = ssub.s32 %s1480_s24, %s2366_s26  ;;  %s1136_s18 = sshll.u32 %s1480_s24, 10 }
  0x58   : > { %p102_p4 = scmp.eq.s32.totalorder %s101_s9, 0  ;;  %s129_s13 = sor.u32 %s128_s11, %s101_s9 }
  0x59   : > { %p130_p5 = scmp.eq.s32.totalorder %s129_s13, 0  ;;  %s2335_s0 = sadd.s32 1, %s1452_s17 }
  0x5a   : > { %s1667_s29 = scalar_select %p102_p4, %s1464_s20, %s104_s27  }
  0x5b   : > { %s1672_s1 = scalar_select %p130_p5, %s1452_s17, %s2335_s0  }
  0x5c   : > { %2334 = sst [smem:[#allocation27_spill]] %s1667_s29  ;;  %s2337_s3 = sld [smem:[#allocation32_spill]] }
  0x5d   : > { %2336 = sst [smem:[#allocation28_spill]] %s1672_s1  ;;  %s206_s6 = scalar_lea.vmem [#allocation10], %s1032_s12 }
  0x5e   : > { %s213_s26 = sshll.u32 %s206_s6, 4  ;;  %p1685_p7 = pnand %p1174_p0, %p1656_p13  ;;  %s1679_s26 = int_to_ptr.vmem [resolvable:$true] %s213_s26 }
  0x5f   : > { %s1689_s0 = scalar_lea.sflag [#allocation4], %s202_s8 }
  0x60   : > { %p1326_p6 = pneg %p1685_p7 }
  0x62   : > { %s1677_s23 = scalar_lea.hbm %s2337_s3, %s1136_s18  ;;  %s1329_s11 = scalar_lea.hbm %s2337_s3, 2048 }
  0x63   : > { %s1324_s2 = scalar_lea.hbm %s1677_s23, 1024  ;;  %p1330_p11 = scmp.lt.u32.totalorder %s1677_s23, %s2337_s3 }
  0x64   : > { %p1325_p9 = scmp.ne.s32.totalorder %s1677_s23, %s1324_s2  ;;  %p1331_p2 = scmp.lt.u32.totalorder %s1329_s11, %s1324_s2 }
  0x65   : > { %p1333_p10 = scmp.lt.u32.totalorder %s1324_s2, %s1677_s23 }
  0x66   : > { %p1327_p1 = pnand %p1326_p6, %p1325_p9  ;;  %p1332_p8 = por %p1331_p2, %p1330_p11 }
  0x68   : > { %p1328_p3 = pneg %p1327_p1  ;;  %p1334_p12 = por %p1333_p10, %p1332_p8 }
  0x6a   : > { %p1335_p0 = pnand %p1334_p12, %p1328_p3 }
  0x6c   : > { %1338 = shalt.err (!%p1335_p0)
}
  0x6d   : > { %s1339_s8 = scalar_lea.vmem %s1679_s26, 1024  ;;  %s1489_s9 = smov [#allocation10]  }
  0x6e   : > { %p1340_p13 = scmp.ne.s32.totalorder %s1679_s26, %s1339_s8  ;;  %s1344_s13 = sshll.u32 %s1489_s9, 4  ;;  %s1345_s13 = int_to_ptr.vmem [resolvable:$false] %s1344_s13 }
  0x6f   : > { %s1346_s18 = scalar_lea.vmem %s1345_s13, 2048  ;;  %p1347_p9 = scmp.lt.s32.totalorder %s1679_s26, %s1345_s13 }
  0x70   : > { %p1342_p4 = pnand %p1340_p13, %p1326_p6  ;;  %p1348_p1 = scmp.lt.s32.totalorder %s1346_s18, %s1339_s8 }
  0x72   : > { %p1343_p5 = pneg %p1342_p4  ;;  %p1349_p11 = por %p1348_p1, %p1347_p9 }
  0x74   : > { %p1350_p2 = pnand %p1349_p11, %p1343_p5 }
  0x76   : > { %1353 = shalt.err (!%p1350_p2)
}
  0x77   : > { %s1490_s2 = smov 128   ;;  %s1491_s6 = smov 8  }
  0x78   : > { %1166 = dma.hbm_to_vmem [thread:$0]  (!%p1685_p7), %s1677_s23, 1024, %s1679_s26, %s1689_s0, %s1490_s2, %s1490_s2, %s1491_s6  }
  0x79   : > { %p2339_p6 = scmp.ne.s32.totalorder %s2327_s10, 0 }
  0x7a   : > { %p2340_p3 = scmp.ne.s32.totalorder (!%p2339_p6), %s2320_s28, 0 }
  0x7b   : > { %225 = sbr.rel (%p2339_p6) target bundleno = 469 (0x1d5), region = 36 }
  0x82   : > { %1427 = dma.done.wait (%p2340_p3), [#allocation6], 16  }
  0x83   : > { %1429 = vsyncadd (%p2340_p3), [#allocation6], 4294967280 }
  0x84   : > { %1431 = dma.done.wait (%p2340_p3), [#allocation8], 32  }
  0x85   : > { %1433 = vsyncadd (%p2340_p3), [#allocation8], 4294967264  ;;  %s239_s14 = sand.u32 1, %s1460_s19   ;;  %p2341_p7 = scmp.ne.s32.totalorder %s2321_s30, 0 }
  0x86   : > { %s1039_s27 = sshll.u32 %s239_s14, 6  ;;  %s240_s23 = scalar_lea.sflag [#allocation4], %s239_s14 }
  0x87   : > { %s1728_s26 = scalar_lea.vmem [#allocation10], %s1039_s27 }
  0x88   : > { %1435 = dma.done.wait (%p2341_p7), %s240_s23, 1024  }
  0x89   : > { %1437 = vsyncadd (%p2341_p7), %s240_s23, 4294966272 }
  0x8a   : > { %248 = sfence }
  0x8b   : > { %v286_v0 = vld [vmem:[%s1728_s26 + $0x10] sm:$0xff]  ;;  %v284_v1 = vld [vmem:[%s1728_s26] sm:$0xff]  ;;  %vm270_vm0 = vcmask 146432   ;;  %s1492_s28 = smov 1   ;;  %vm273_vm1 = vcmask 140288   ;;  %v287_v2 = vld [vmem:[%s1728_s26 + $0x18] sm:$0xff] }
  0x8c   : > { %304 = vrot.lane.b32.xlu1 %v286_v0, %s1492_s28  ;;  %300 = vrot.lane.b32.xlu0 %v284_v1, %s1492_s28  ;;  %v285_v3 = vld [vmem:[%s1728_s26 + $0x8] sm:$0xff]  ;;  %v1493_v4 = vmov 0.0   ;;  %v288_v6 = vld [vmem:[%s1728_s26 + $0x20] sm:$0xff]  ;;  %vm324_vm2 = vcmask 138248   ;;  %s1747_s10 = sld [smem:[#allocation3 + $0xa]]  ;;  %s1751_s0 = sld [smem:[#allocation3 + $0x1]] }
  0x8d   : > { %275 = vst.msk [vmem:[#allocation2 + $0x18] sm:$0xff] %vm270_vm0, %v1493_v4  ;;  %276 = vst.msk [vmem:[#allocation2 + $0x20] sm:$0xff] %vm270_vm0, %v1493_v4  ;;  %v289_v5 = vld [vmem:[%s1728_s26 + $0x28] sm:$0xff]  ;;  %v291_v7 = vld [vmem:[%s1728_s26 + $0x38] sm:$0xff]  ;;  %s1753_s11 = sld [smem:[#allocation3 + $0xb]]  ;;  %s1755_s7 = sld [smem:[#allocation3 + $0x2]] }
  0x8e   : > { %271 = vst.msk [vmem:[#allocation2] sm:$0xff] %vm270_vm0, %v1493_v4  ;;  %272 = vst.msk [vmem:[#allocation2 + $0x8] sm:$0xff] %vm270_vm0, %v1493_v4  ;;  %v290_v8 = vld [vmem:[%s1728_s26 + $0x30] sm:$0xff]  ;;  %s1757_s12 = sld [smem:[#allocation3 + $0x14]]  ;;  %s1759_s8 = sld [smem:[#allocation3 + $0x13]]  ;;  %vm361_vm3 = vcmask 1046528  }
  0x8f   : > { %278 = vst.msk [vmem:[#allocation2 + $0x30] sm:$0xff] %vm270_vm0, %v1493_v4  ;;  %279 = vst.msk [vmem:[#allocation2 + $0x38] sm:$0xff] %vm270_vm0, %v1493_v4  ;;  %s1761_s9 = sld [smem:[#allocation3 + $0x1d]]  ;;  %s1763_s13 = sld [smem:[#allocation3 + $0x1c]]  ;;  %vm399_vm4 = vcmask 1045504   ;;  %vm845_vm5 = vcmask 130048  }
  0x90   : > { %281 = vst.msk [vmem:[#allocation2 + $0x48] sm:$0xff] %vm270_vm0, %v1493_v4  ;;  %282 = vst.msk [vmem:[#allocation2 + $0x50] sm:$0xff] %vm270_vm0, %v1493_v4  ;;  %306 = vrot.lane.b32.xlu1 %v287_v2, %s1492_s28  ;;  %302 = vrot.lane.b32.xlu0 %v285_v3, %s1492_s28  ;;  %s1765_s18 = sld [smem:[#allocation3 + $0x4]]  ;;  %s1769_s2 = sld [smem:[#allocation3 + $0xd]] }
  0x91   : > { %277 = vst.msk [vmem:[#allocation2 + $0x28] sm:$0x3] %vm273_vm1, %v1493_v4  ;;  %274 = vst.msk [vmem:[#allocation2 + $0x10] sm:$0x3] %vm273_vm1, %v1493_v4  ;;  %s1771_s6 = sld [smem:[#allocation3 + $0xe]]  ;;  %s1773_s14 = sld [smem:[#allocation3 + $0x5]] }
  0x92   : > { %280 = vst.msk [vmem:[#allocation2 + $0x40] sm:$0x3] %vm273_vm1, %v1493_v4  ;;  %283 = vst.msk [vmem:[#allocation2 + $0x58] sm:$0x3] %vm273_vm1, %v1493_v4  ;;  %s1775_s27 = sld [smem:[#allocation3 + $0x17]]  ;;  %s1777_s23 = sld [smem:[#allocation3 + $0x16]]  ;;  %v463_v17 = vstv %s1747_s10  ;;  %v340_v18 = vstv %s1751_s0 }
  0x93   : > { %s1779_s26 = sld [smem:[#allocation3 + $0x7]]  ;;  %s1783_s30 = sld [smem:[#allocation3 + $0x20]]  ;;  %v471_v21 = vstv %s1753_s11  ;;  %v348_v22 = vstv %s1755_s7 }
  0x94   : > { %310 = vrot.lane.b32.xlu1 %v289_v5, %s1492_s28  ;;  %308 = vrot.lane.b32.xlu0 %v288_v6, %s1492_s28  ;;  %s1785_s3 = sld [smem:[#allocation3 + $0x10]]  ;;  %s1787_s24 = sld [smem:[#allocation3 + $0x11]]  ;;  %v600_v25 = vstv %s1757_s12  ;;  %v592_v26 = vstv %s1759_s8 }
  0x95   : > { %s1791_s29 = sld [smem:[#allocation3 + $0x8]]  ;;  %s1793_s20 = sld [smem:[#allocation3 + $0x1a]]  ;;  %v729_v27 = vstv %s1761_s9  ;;  %v721_v28 = vstv %s1763_s13 }
  0x96   : > { %s1795_s19 = sld [smem:[#allocation3 + $0x19]]  ;;  %s2342_s1 = sshll.u32 %s1468_s21, 3  ;;  %v368_v29 = vstv %s1765_s18  ;;  %v490_v30 = vstv %s1769_s2 }
  0x97   : > { %s1799_s17 = scalar_lea.vmem [#allocation2], %s2342_s1  ;;  %s1809_s10 = sld [smem:[#allocation3 + $0x23]]  ;;  %v503_v31 = vstv %s1771_s6  ;;  %v381_v32 = vstv %s1773_s14 }
  0x98   : > { %314 = vrot.lane.b32.xlu1 %v291_v7, %s1492_s28  ;;  %312 = vrot.lane.b32.xlu0 %v290_v8, %s1492_s28  ;;  %s1781_s28 = sld [smem:[#allocation3 + $0x1f]]  ;;  %s1815_s1 = sld [smem:[#allocation3 + $0x3]]  ;;  %v632_v33 = vstv %s1775_s27  ;;  %v619_v34 = vstv %s1777_s23 }
  0x99   : > { %s1817_s0 = sld [smem:[#allocation3 + $0xc]]  ;;  %s1823_s11 = sld [smem:[#allocation3 + $0x15]]  ;;  %v406_v35 = vstv %s1779_s26  ;;  %v761_v41 = vstv %s1783_s30 }
  0x9a   : > { %s1825_s7 = sld [smem:[#allocation3 + $0x6]]  ;;  %s1494_s12 = smov 127   ;;  %v527_v42 = vstv %s1785_s3  ;;  %v540_v44 = vstv %s1787_s24 }
  0x9b   : > { %v419_v45 = vstv %s1791_s29  ;;  %v669_v46 = vstv %s1793_s20  ;;  %s1495_s8 = smov 126   ;;  %s1873_s30 = sld [smem:[#allocation3 + $0x1e]] }
  0x9c   : > { %v656_v49 = vstv %s1795_s19  ;;  %s1875_s9 = sld [smem:[#allocation3 + $0xf]]  ;;  %s1885_s13 = sld [smem:[#allocation3 + $0x18]] }
  0x9d   : > { %v798_v53 = vstv %s1809_s10  ;;  %s1888_s18 = sld [smem:[#allocation3 + $0x21]]  ;;  %s1960_s3 = sld [smem:[#allocation3 + $0x22]] }
  0x9e   : > { %v748_v36 = vstv %s1781_s28  ;;  %v356_v56 = vstv %s1815_s1  ;;  %s336_s19 = sld [smem:[#allocation3]]  ;;  %s1080_s20 = sld [smem:[#allocation3 + $0x12]] }
  0x9f   : > { %v479_v57 = vstv %s1817_s0  ;;  %v608_v61 = vstv %s1823_s11  ;;  %s1100_s24 = sld [smem:[#allocation3 + $0x1b]]  ;;  %s2047_s29 = sld [smem:[#allocation7 + $0x1]] }
  0xa0   : > { %v394_v62 = vstv %s1825_s7  ;;  %s2049_s2 = sld [smem:[#allocation7 + $0x5]]  ;;  %s2051_s6 = sld [smem:[#allocation7 + $0x9]] }
  0xa1   : > { %s2053_s14 = sld [smem:[#allocation7 + $0xd]]  ;;  %s2055_s27 = sld [smem:[#allocation7 + $0x11]] }
  0xa2   : > { %s2057_s23 = sld [smem:[#allocation7 + $0x15]]  ;;  %s2059_s26 = sld [smem:[#allocation7 + $0x19]] }
  0xa3   : > { %s2061_s28 = sld [smem:[#allocation7 + $0x1d]]  ;;  %s2063_s10 = sld [smem:[#allocation7]] }
  0xa4   : > { %s2065_s1 = sld [smem:[#allocation7 + $0x4]]  ;;  %s2067_s0 = sld [smem:[#allocation7 + $0x8]] }
  0xa5   : > { %s2069_s11 = sld [smem:[#allocation7 + $0xc]]  ;;  %s2073_s7 = sld [smem:[#allocation7 + $0x10]] }
  0xa6   : > { %s2100_s15 = sld [smem:[#allocation7 + $0x3]]  ;;  %s2102_s25 = sld [smem:[#allocation7 + $0x7]] }
  0xa7   : > { %s2107_s5 = sld [smem:[#allocation7 + $0xb]]  ;;  %s2109_s4 = sld [smem:[#allocation7 + $0xf]] }
  0xfe   : > { %v305_v9 = vpop.permute.xlu1 %304  ;;  %v301_v10 = vpop.permute.xlu0 %300 }
  0xff   : > { %327 = vst.msk [vmem:[#allocation2 + $0x19] sm:$0xff] %vm324_vm2, %v305_v9  ;;  %325 = vst.msk [vmem:[#allocation2 + $0x1] sm:$0xff] %vm324_vm2, %v301_v10 }
 0x102   : > { %v307_v11 = vpop.permute.xlu1 %306  ;;  %v303_v12 = vpop.permute.xlu0 %302 }
 0x103   : > { %328 = vst.msk [vmem:[#allocation2 + $0x21] sm:$0xff] %vm324_vm2, %v307_v11  ;;  %326 = vst.msk [vmem:[#allocation2 + $0x9] sm:$0xff] %vm324_vm2, %v303_v12 }
 0x106   : > { %v311_v13 = vpop.permute.xlu1 %310  ;;  %v309_v14 = vpop.permute.xlu0 %308 }
 0x107   : > { %330 = vst.msk [vmem:[#allocation2 + $0x39] sm:$0xff] %vm324_vm2, %v311_v13  ;;  %329 = vst.msk [vmem:[#allocation2 + $0x31] sm:$0xff] %vm324_vm2, %v309_v14 }
 0x10a   : > { %v315_v15 = vpop.permute.xlu1 %314  ;;  %v313_v16 = vpop.permute.xlu0 %312 }
 0x10b   : > { %332 = vst.msk [vmem:[#allocation2 + $0x51] sm:$0xff] %vm324_vm2, %v315_v15  ;;  %331 = vst.msk [vmem:[#allocation2 + $0x49] sm:$0xff] %vm324_vm2, %v313_v16 }
 0x112   : > { %v1802_v19 = vld [vmem:[%s1799_s17 + $0x18] sm:$0xff]  ;;  %v1805_v20 = vld [vmem:[%s1799_s17] sm:$0xff]  ;;  %v1838_v39 = vld [vmem:[%s1799_s17 + $0x8] sm:$0x3] }
 0x113   : > { %v464_v23 = vmul.f32 %v1802_v19, %v463_v17  ;;  %v341_v24 = vmul.f32 %v340_v18, %v1805_v20  ;;  %v472_v37 = vmul.f32 %v1802_v19, %v471_v21  ;;  %v349_v38 = vmul.f32 %v348_v22, %v1805_v20  ;;  %v1841_v40 = vld [vmem:[%s1799_s17 + $0x20] sm:$0x3]  ;;  %v1846_v43 = vld [vmem:[%s1799_s17 + $0x30] sm:$0xff]  ;;  %v1854_v47 = vld [vmem:[%s1799_s17 + $0x48] sm:$0xff] }
 0x114   : > { %v369_v48 = vmul.f32 %v368_v29, %v1805_v20  ;;  %v370_v50 = vmul.f32 %v368_v29, %v1838_v39  ;;  %v491_v51 = vmul.f32 %v1802_v19, %v490_v30  ;;  %v492_v52 = vmul.f32 %v1841_v40, %v490_v30  ;;  %v1869_v60 = vld [vmem:[%s1799_s17 + $0x38] sm:$0x3]  ;;  %v1883_v3 = vld [vmem:[%s1799_s17 + $0x50] sm:$0x3]  ;;  %s1060_s17 = sld [smem:[#allocation3 + $0x9]] }
 0x115   : > { %466 = vrot.lane.b32.xlu1 %v464_v23, %s1494_s12  ;;  %343 = vrot.lane.b32.xlu0 %v341_v24, %s1494_s12  ;;  %v601_v54 = vmul.f32 %v1846_v43, %v600_v25  ;;  %v593_v55 = vmul.f32 %v1846_v43, %v592_v26  ;;  %v730_v58 = vmul.f32 %v1854_v47, %v729_v27 }
 0x116   : > { %v722_v59 = vmul.f32 %v1854_v47, %v721_v28  ;;  %v373_v63 = vrot.slane %v369_v48, 1  ;;  %v504_v0 = vmul.f32 %v1802_v19, %v503_v31  ;;  %v505_v1 = vmul.f32 %v1841_v40, %v503_v31 }
 0x117   : > { %v382_v2 = vmul.f32 %v381_v32, %v1805_v20  ;;  %v374_v4 = vrot.slane %v370_v50, 1  ;;  %v495_v5 = vrot.slane %v491_v51, 1  ;;  %v496_v6 = vrot.slane %v492_v52, 1 }
 0x118   : > { %v383_v7 = vmul.f32 %v381_v32, %v1838_v39  ;;  %v633_v8 = vmul.f32 %v1846_v43, %v632_v33  ;;  %v634_v9 = vmul.f32 %v1869_v60, %v632_v33  ;;  %v620_v10 = vmul.f32 %v1846_v43, %v619_v34 }
 0x119   : > { %474 = vrot.lane.b32.xlu1 %v472_v37, %s1495_s8  ;;  %351 = vrot.lane.b32.xlu0 %v349_v38, %s1495_s8  ;;  %v621_v11 = vmul.f32 %v1869_v60, %v619_v34  ;;  %v407_v12 = vmul.f32 %v406_v35, %v1805_v20  ;;  %v408_v13 = vmul.f32 %v406_v35, %v1838_v39  ;;  %v508_v16 = vrot.slane %v504_v0, 1 }
 0x11a   : > { %v749_v14 = vmul.f32 %v1854_v47, %v748_v36  ;;  %v750_v15 = vmul.f32 %v1883_v3, %v748_v36  ;;  %v509_v17 = vrot.slane %v505_v1, 1  ;;  %v762_v18 = vmul.f32 %v1854_v47, %v761_v41 }
 0x11b   : > { %v763_v21 = vmul.f32 %v1883_v3, %v761_v41  ;;  %v375_v22 = vsel %vm361_vm3, %v373_v63, %v374_v4  ;;  %v497_v23 = vsel %vm361_vm3, %v495_v5, %v496_v6  ;;  %v386_v24 = vrot.slane %v382_v2, 1 }
 0x11c   : > { %v387_v25 = vrot.slane %v383_v7, 1  ;;  %v637_v26 = vrot.slane %v633_v8, 1  ;;  %v638_v27 = vrot.slane %v634_v9, 1  ;;  %v624_v28 = vrot.slane %v620_v10, 1 }
 0x11d   : > { %603 = vrot.lane.b32.xlu1 %v601_v54, %s1495_s8  ;;  %595 = vrot.lane.b32.xlu0 %v593_v55, %s1494_s12  ;;  %v625_v29 = vrot.slane %v621_v11, 1  ;;  %v411_v30 = vrot.slane %v407_v12, 2  ;;  %v412_v31 = vrot.slane %v408_v13, 2  ;;  %v753_v32 = vrot.slane %v749_v14, 1 }
 0x11e   : > { %v754_v33 = vrot.slane %v750_v15, 1  ;;  %v766_v34 = vrot.slane %v762_v18, 1  ;;  %v767_v35 = vrot.slane %v763_v21, 1  ;;  %v528_v36 = vmul.f32 %v1802_v19, %v527_v42 }
 0x11f   : > { %v529_v37 = vmul.f32 %v1841_v40, %v527_v42  ;;  %v737_v38 = vstv %s1873_s30  ;;  %v516_v41 = vstv %s1875_s9  ;;  %v645_v48 = vstv %s1885_s13  ;;  %s2079_s30 = sld [smem:[#allocation7 + $0x1c]]  ;;  %s2081_s9 = sld [smem:[#allocation7 + $0x2]] }
 0x120   : > { %v774_v50 = vstv %s1888_s18  ;;  %v510_v51 = vsel %vm361_vm3, %v508_v16, %v509_v17  ;;  %v388_v52 = vsel %vm361_vm3, %v386_v24, %v387_v25  ;;  %v639_v54 = vsel %vm361_vm3, %v637_v26, %v638_v27  ;;  %s2083_s13 = sld [smem:[#allocation7 + $0x6]]  ;;  %s2085_s18 = sld [smem:[#allocation7 + $0xa]] }
 0x121   : > { %732 = vrot.lane.b32.xlu1 %v730_v58, %s1495_s8  ;;  %724 = vrot.lane.b32.xlu0 %v722_v59, %s1494_s12  ;;  %v626_v55 = vsel %vm361_vm3, %v624_v28, %v625_v29  ;;  %v413_v42 = vsel %vm399_vm4, %v411_v30, %v412_v31  ;;  %v755_v58 = vsel %vm361_vm3, %v753_v32, %v754_v33  ;;  %v532_v1 = vrot.slane %v528_v36, 2 }
 0x122   : > { %v541_v59 = vmul.f32 %v1802_v19, %v540_v44  ;;  %v542_v63 = vmul.f32 %v1841_v40, %v540_v44  ;;  %v768_v0 = vsel %vm361_vm3, %v766_v34, %v767_v35  ;;  %v533_v2 = vrot.slane %v529_v37, 2 }
 0x123   : > { %v420_v4 = vmul.f32 %v419_v45, %v1805_v20  ;;  %v358_v5 = vmul.f32 %v356_v56, %v1838_v39  ;;  %v357_v6 = vmul.f32 %v356_v56, %v1805_v20  ;;  %v480_v44 = vmul.f32 %v1802_v19, %v479_v57 }
 0x124   : > { %v481_v7 = vmul.f32 %v1841_v40, %v479_v57  ;;  %v421_v8 = vmul.f32 %v419_v45, %v1838_v39  ;;  %v609_v9 = vmul.f32 %v1846_v43, %v608_v61  ;;  %v610_v10 = vmul.f32 %v1869_v60, %v608_v61 }
 0x125   : > { %376 = vrot.lane.b32.xlu1 %v375_v22, %s1494_s12  ;;  %498 = vrot.lane.b32.xlu0 %v497_v23, %s1494_s12  ;;  %v395_v11 = vmul.f32 %v394_v62, %v1805_v20  ;;  %v363_v56 = vrot.slane %v358_v5, 1  ;;  %v362_v12 = vrot.slane %v357_v6, 1  ;;  %v484_v13 = vrot.slane %v480_v44, 1 }
 0x126   : > { %v485_v14 = vrot.slane %v481_v7, 1  ;;  %v613_v45 = vrot.slane %v609_v9, 1  ;;  %v614_v57 = vrot.slane %v610_v10, 1  ;;  %v396_v15 = vmul.f32 %v394_v62, %v1838_v39 }
 0x127   : > { %v400_v61 = vrot.slane %v395_v11, 2  ;;  %v1966_v16 = vsel %vm361_vm3, %v362_v12, %v363_v56  ;;  %v738_v18 = vmul.f32 %v1854_v47, %v737_v38  ;;  %v739_v21 = vmul.f32 %v1883_v3, %v737_v38 }
 0x128   : > { %v1969_v17 = vsel %vm361_vm3, %v484_v13, %v485_v14  ;;  %v1974_v22 = vsel %vm361_vm3, %v613_v45, %v614_v57  ;;  %v401_v23 = vrot.slane %v396_v15, 2  ;;  %v517_v24 = vmul.f32 %v1802_v19, %v516_v41 }
 0x129   : > { %511 = vrot.lane.b32.xlu1 %v510_v51, %s1495_s8  ;;  %389 = vrot.lane.b32.xlu0 %v388_v52, %s1495_s8  ;;  %v518_v39 = vmul.f32 %v1841_v40, %v516_v41  ;;  %v545_v62 = vrot.slane %v541_v59, 2  ;;  %v546_v25 = vrot.slane %v542_v63, 2  ;;  %v742_v26 = vrot.slane %v738_v18, 1 }
 0x12a   : > { %v743_v27 = vrot.slane %v739_v21, 1  ;;  %v670_v28 = vmul.f32 %v1846_v43, %v669_v46  ;;  %v1984_v29 = vsel %vm399_vm4, %v400_v61, %v401_v23  ;;  %v521_v30 = vrot.slane %v517_v24, 2 }
 0x12b   : > { %v522_v40 = vrot.slane %v518_v39, 2  ;;  %v534_v31 = vsel %vm399_vm4, %v532_v1, %v533_v2  ;;  %v424_v32 = vrot.slane %v420_v4, 2  ;;  %v671_v33 = vmul.f32 %v1869_v60, %v669_v46 }
 0x12c   : > { %v1991_v34 = vsel %vm361_vm3, %v742_v26, %v743_v27  ;;  %v425_v35 = vrot.slane %v421_v8, 2  ;;  %v657_v36 = vmul.f32 %v1846_v43, %v656_v49  ;;  %v646_v38 = vmul.f32 %v1846_v43, %v645_v48 }
 0x12d   : > { %640 = vrot.lane.b32.xlu1 %v639_v54, %s1495_s8  ;;  %627 = vrot.lane.b32.xlu0 %v626_v55, %s1494_s12  ;;  %v1997_v37 = vsel %vm399_vm4, %v521_v30, %v522_v40  ;;  %v658_v41 = vmul.f32 %v1869_v60, %v656_v49  ;;  %v647_v51 = vmul.f32 %v1869_v60, %v645_v48  ;;  %v674_v55 = vrot.slane %v670_v28, 2 }
 0x12e   : > { %v775_v46 = vmul.f32 %v1854_v47, %v774_v50  ;;  %v776_v52 = vmul.f32 %v1883_v3, %v774_v50  ;;  %v547_v54 = vsel %vm399_vm4, %v545_v62, %v546_v25  ;;  %v675_v59 = vrot.slane %v671_v33, 2 }
 0x12f   : > { %v799_v49 = vmul.f32 %v1854_v47, %v798_v53  ;;  %v651_v60 = vrot.slane %v647_v51, 2  ;;  %v426_v63 = vsel %vm399_vm4, %v424_v32, %v425_v35  ;;  %v661_v1 = vrot.slane %v657_v36, 2 }
 0x130   : > { %v779_v48 = vrot.slane %v775_v46, 2  ;;  %v800_v50 = vmul.f32 %v1883_v3, %v798_v53  ;;  %v662_v2 = vrot.slane %v658_v41, 2  ;;  %v676_v7 = vsel %vm399_vm4, %v674_v55, %v675_v59 }
 0x131   : > { %414 = vrot.lane.b32.xlu1 %v413_v42, %s1494_s12  ;;  %756 = vrot.lane.b32.xlu0 %v755_v58, %s1494_s12  ;;  %v785_v42 = vstv %s1960_s3  ;;  %v650_v58 = vrot.slane %v646_v38, 2  ;;  %v803_v8 = vrot.slane %v799_v49, 2  ;;  %v460_v12 = vstv %s1060_s17  ;;  %s2087_s3 = sld [smem:[#allocation7 + $0xe]]  ;;  %s2089_s17 = sld [smem:[#allocation7 + $0x12]] }
 0x132   : > { %v786_v4 = vmul.f32 %v1854_v47, %v785_v42  ;;  %v787_v5 = vmul.f32 %v1883_v3, %v785_v42  ;;  %v663_v53 = vsel %vm399_vm4, %v661_v1, %v662_v2  ;;  %v804_v9 = vrot.slane %v800_v50, 2 }
 0x133   : > { %v2024_v6 = vsel %vm399_vm4, %v650_v58, %v651_v60  ;;  %v337_v13 = vstv %s336_s19  ;;  %v461_v57 = vmul.f32 %v1802_v19, %v460_v12  ;;  %v589_v24 = vstv %s1080_s20  ;;  %s2091_s19 = sld [smem:[#allocation7 + $0x16]]  ;;  %s2093_s20 = sld [smem:[#allocation7 + $0x1a]] }
 0x134   : > { %v790_v10 = vrot.slane %v786_v4, 2  ;;  %v791_v11 = vrot.slane %v787_v5, 2  ;;  %v805_v3 = vsel %vm399_vm4, %v803_v8, %v804_v9  ;;  %v338_v15 = vmul.f32 %v337_v13, %v1805_v20 }
 0x135   : > { %769 = vrot.lane.b32.xlu1 %v768_v0, %s1495_s8  ;;  %535 = vrot.lane.b32.xlu0 %v534_v31, %s1494_s12  ;;  %v780_v0 = vrot.slane %v776_v52, 2  ;;  %v590_v25 = vmul.f32 %v1846_v43, %v589_v24  ;;  %v718_v40 = vstv %s1100_s24  ;;  %s2095_s24 = sld [smem:[#allocation7 + $0x1e]]  ;;  %v553_v60 = vstv %s2047_s29  ;;  %s2127_s29 = sld [smem:[#allocation7 + $0x13]] }
 0x136   : > { %v792_v56 = vsel %vm399_vm4, %v790_v10, %v791_v11  ;;  %v719_v20 = vmul.f32 %v1854_v47, %v718_v40  ;;  %v565_v50 = vstv %s2053_s14  ;;  %v573_v2 = vstv %s2057_s23  ;;  %s2137_s14 = sld [smem:[#allocation7 + $0x1f]]  ;;  %s2143_s23 = sld [smem:[#allocation9 + $0x1]] }
 0x137   : > { %v2029_v44 = vsel %vm399_vm4, %v779_v48, %v780_v0  ;;  %v557_v48 = vstv %s2049_s2  ;;  %v569_v0 = vstv %s2055_s27  ;;  %v432_v8 = vstv %s2063_s10  ;;  %s2129_s2 = sld [smem:[#allocation7 + $0x17]]  ;;  %s2141_s27 = sld [smem:[#allocation9]] }
 0x138   : > { %v438_v10 = vstv %s2067_s0  ;;  %v441_v11 = vstv %s2069_s11  ;;  %v453_v13 = vstv %s2079_s30  ;;  %v694_v24 = vstv %s2087_s3  ;;  %s2153_s10 = sld [smem:[#allocation9 + $0x4]]  ;;  %s2157_s0 = sld [smem:[#allocation9 + $0x6]] }
 0x139   : > { %548 = vrot.lane.b32.xlu1 %v547_v54, %s1495_s8  ;;  %427 = vrot.lane.b32.xlu0 %v426_v63, %s1495_s8  ;;  %v561_v63 = vstv %s2051_s6  ;;  %s2135_s6 = sld [smem:[#allocation7 + $0x1b]]  ;;  %v819_v40 = vstv %s2107_s5  ;;  %s2159_s11 = sld [smem:[#allocation9 + $0x7]] }
 0x13a   : > { %s2343_s5 = sld [smem:[#allocation33_spill]] }
 0x13d   : > { %677 = vrot.lane.b32.xlu1 %v676_v7, %s1495_s8  ;;  %664 = vrot.lane.b32.xlu0 %v663_v53, %s1494_s12  ;;  %v581_v7 = vstv %s2061_s28  ;;  %v435_v53 = vstv %s2065_s1  ;;  %s2151_s28 = sld [smem:[#allocation9 + $0x3]]  ;;  %s2155_s1 = sld [smem:[#allocation9 + $0x5]] }
 0x141   : > { %806 = vrot.lane.b32.xlu1 %v805_v3, %s1495_s8  ;;  %793 = vrot.lane.b32.xlu0 %v792_v56, %s1494_s12  ;;  %s2075_s12 = sld [smem:[#allocation7 + $0x14]]  ;;  %s2077_s8 = sld [smem:[#allocation7 + $0x18]]  ;;  %v444_v3 = vstv %s2073_s7 }
 0x142   : > { %s266_s7 = sand.u32 1, %s1448_s16  }
 0x147   : > { %v447_v56 = vstv %s2075_s12  ;;  %v450_v12 = vstv %s2077_s8  ;;  %s1132_s12 = sshll.u32 %s1472_s22, 4  ;;  %s1040_s8 = sshll.u32 %s266_s7, 6 }
 0x148   : > { %s2195_s22 = sadd.s32 %s1468_s21, %s1132_s12  ;;  %s268_s21 = scalar_lea.vmem [#allocation11], %s1040_s8 }
 0x149   : > { %s1133_s30 = sshll.u32 %s2195_s22, 7 }
 0x187   : > { %v467_v14 = vpop.permute.xlu1 %466  ;;  %v344_v45 = vpop.permute.xlu0 %343 }
 0x188   : > { %v469_v61 = vadd.f32 %v467_v14, %v461_v57  ;;  %v346_v18 = vadd.f32 %v344_v45, %v338_v15  ;;  %v682_v14 = vstv %s2081_s9  ;;  %v686_v15 = vstv %s2083_s13  ;;  %s897_s9 = sshll.u32 %s268_s21, 4  ;;  %s2344_s13 = sld [smem:[#allocation23_spill]]  ;;  %s2211_s9 = int_to_ptr.vmem [resolvable:$true] %s897_s9 }
 0x189   : > { %s1354_s3 = scalar_lea.vmem %s2211_s9, 1024 }
 0x18a   : > { %p1355_p8 = scmp.ne.s32.totalorder %s2211_s9, %s1354_s3 }
 0x18b   : > { %v475_v21 = vpop.permute.xlu1 %474  ;;  %v352_v23 = vpop.permute.xlu0 %351 }
 0x18c   : > { %v477_v39 = vadd.f32 %v475_v21, %v469_v61  ;;  %v354_v62 = vadd.f32 %v352_v23, %v346_v18  ;;  %v690_v23 = vstv %s2085_s18  ;;  %s2223_s18 = scalar_lea.sflag [#allocation5], %s266_s7 }
 0x18e   : > { %v366_v26 = vadd.f32 %v1966_v16, %v354_v62  ;;  %v488_v27 = vadd.f32 %v1969_v17, %v477_v39  ;;  %v698_v39 = vstv %s2089_s17  ;;  %v702_v62 = vstv %s2091_s19  ;;  %p2345_p10 = scmp.ne.s32.totalorder %s2344_s13, 0  ;;  %s1496_s17 = smov [#allocation11]  }
 0x18f   : > { %v604_v28 = vpop.permute.xlu1 %603  ;;  %v596_v30 = vpop.permute.xlu0 %595  ;;  %s1358_s19 = sshll.u32 %s1496_s17, 4  ;;  %s1359_s19 = int_to_ptr.vmem [resolvable:$false] %s1358_s19 }
 0x190   : > { %v598_v31 = vadd.f32 %v596_v30, %v590_v25  ;;  %v815_v30 = vstv %s2102_s25  ;;  %p1356_p12 = pnand %p1355_p8, %p2345_p10  ;;  %p1361_p13 = scmp.lt.s32.totalorder %s2211_s9, %s1359_s19 }
 0x192   : > { %v606_v19 = vadd.f32 %v604_v28, %v598_v31  ;;  %v811_v28 = vstv %s2100_s15  ;;  %v823_v31 = vstv %s2109_s4  ;;  %s2209_s4 = scalar_lea.hbm %s2343_s5, %s1133_s30  ;;  %p1357_p0 = pneg %p1356_p12 }
 0x193   : > { %v733_v32 = vpop.permute.xlu1 %732  ;;  %v725_v33 = vpop.permute.xlu0 %724 }
 0x194   : > { %v727_v35 = vadd.f32 %v725_v33, %v719_v20  ;;  %v617_v36 = vadd.f32 %v1974_v22, %v606_v19 }
 0x196   : > { %v735_v38 = vadd.f32 %v733_v32, %v727_v35 }
 0x197   : > { %v377_v41 = vpop.permute.xlu1 %376  ;;  %v499_v51 = vpop.permute.xlu0 %498 }
 0x198   : > { %v746_v43 = vadd.f32 %v1991_v34, %v735_v38  ;;  %v379_v16 = vadd.f32 %v377_v41, %v366_v26  ;;  %v501_v47 = vadd.f32 %v499_v51, %v488_v27  ;;  %v706_v26 = vstv %s2093_s20  ;;  %s1360_s20 = scalar_lea.vmem %s1359_s19, 2048 }
 0x199   : > { %v710_v27 = vstv %s2095_s24  ;;  %p1362_p4 = scmp.lt.s32.totalorder %s1360_s20, %s1354_s3 }
 0x19b   : > { %v512_v17 = vpop.permute.xlu1 %511  ;;  %v390_v22 = vpop.permute.xlu0 %389  ;;  %p1363_p5 = por %p1362_p4, %p1361_p13 }
 0x19c   : > { %v514_v34 = vadd.f32 %v512_v17, %v501_v47  ;;  %v392_v46 = vadd.f32 %v390_v22, %v379_v16 }
 0x19d   : > { %p1364_p9 = pnand %p1363_p5, %p1357_p0 }
 0x19e   : > { %v404_v52 = vadd.f32 %v1984_v29, %v392_v46  ;;  %v525_v54 = vadd.f32 %v1997_v37, %v514_v34 }
 0x19f   : > { %v641_v55 = vpop.permute.xlu1 %640  ;;  %v628_v42 = vpop.permute.xlu0 %627 }
 0x1a0   : > { %v630_v58 = vadd.f32 %v628_v42, %v617_v36 }
 0x1a2   : > { %v643_v29 = vadd.f32 %v641_v55, %v630_v58 }
 0x1a3   : > { %v415_v37 = vpop.permute.xlu1 %414  ;;  %v757_v59 = vpop.permute.xlu0 %756 }
 0x1a4   : > { %v2098_v49 = vadd.f32 %v2024_v6, %v643_v29  ;;  %v759_v1 = vadd.f32 %v757_v59, %v746_v43  ;;  %v577_v6 = vstv %s2059_s26  ;;  %v417_v45 = vadd.f32 %v415_v37, %v404_v52  ;;  %s2149_s26 = sld [smem:[#allocation9 + $0x2]] }
 0x1a7   : > { %v770_v4 = vpop.permute.xlu1 %769  ;;  %v536_v5 = vpop.permute.xlu0 %535 }
 0x1a8   : > { %v772_v9 = vadd.f32 %v770_v4, %v759_v1  ;;  %v538_v57 = vadd.f32 %v536_v5, %v525_v54  ;;  %v835_v4 = vstv %s2135_s6  ;;  %v839_v5 = vstv %s2137_s14 }
 0x1aa   : > { %v783_v61 = vadd.f32 %v2029_v44, %v772_v9  ;;  %v858_v9 = vstv %s2151_s28 }
 0x1ab   : > { %v549_v18 = vpop.permute.xlu1 %548  ;;  %v428_v21 = vpop.permute.xlu0 %427 }
 0x1ac   : > { %v551_v25 = vadd.f32 %v549_v18, %v538_v57  ;;  %v430_v44 = vadd.f32 %v428_v21, %v417_v45 }
 0x1ae   : > { %v554_v19 = vmul.f32 %v553_v60, %v551_v25  ;;  %v558_v20 = vmul.f32 %v557_v48, %v551_v25  ;;  %v562_v32 = vmul.f32 %v561_v63, %v551_v25  ;;  %v566_v33 = vmul.f32 %v565_v50, %v551_v25 }
 0x1af   : > { %v570_v35 = vmul.f32 %v569_v0, %v551_v25  ;;  %v574_v36 = vmul.f32 %v573_v2, %v551_v25  ;;  %v578_v38 = vmul.f32 %v577_v6, %v551_v25  ;;  %v582_v41 = vmul.f32 %v581_v7, %v551_v25  ;;  %v665_v51 = vpop.permute.xlu0 %664  ;;  %v678_v22 = vpop.permute.xlu1 %677 }
 0x1b0   : > { %v433_v43 = vmul.f32 %v432_v8, %v430_v44  ;;  %v436_v16 = vmul.f32 %v435_v53, %v430_v44  ;;  %v439_v47 = vmul.f32 %v438_v10, %v430_v44  ;;  %v442_v17 = vmul.f32 %v441_v11, %v430_v44 }
 0x1b1   : > { %v445_v34 = vmul.f32 %v444_v3, %v430_v44  ;;  %v448_v46 = vmul.f32 %v447_v56, %v430_v44  ;;  %v451_v52 = vmul.f32 %v450_v12, %v430_v44  ;;  %v454_v54 = vmul.f32 %v453_v13, %v430_v44 }
 0x1b2   : > { %v555_v55 = vadd.f32 %v554_v19, %v433_v43  ;;  %v559_v42 = vadd.f32 %v558_v20, %v436_v16  ;;  %v563_v58 = vadd.f32 %v562_v32, %v439_v47  ;;  %v567_v29 = vadd.f32 %v566_v33, %v442_v17 }
 0x1b3   : > { %v571_v37 = vadd.f32 %v570_v35, %v445_v34  ;;  %v575_v59 = vadd.f32 %v574_v36, %v448_v46  ;;  %v579_v60 = vadd.f32 %v578_v38, %v451_v52  ;;  %v583_v48 = vadd.f32 %v582_v41, %v454_v54  ;;  %v794_v63 = vpop.permute.xlu0 %793  ;;  %v807_v53 = vpop.permute.xlu1 %806 }
 0x1b4   : > { %v667_v1 = vadd.f32 %v665_v51, %v2098_v49  ;;  %v827_v50 = vstv %s2127_s29  ;;  %v831_v0 = vstv %s2129_s2  ;;  %v796_v2 = vadd.f32 %v794_v63, %v783_v61 }
 0x1b5   : > { %v843_v6 = vstv %s2141_s27  ;;  %v848_v7 = vstv %s2143_s23  ;;  %v853_v49 = vstv %s2149_s26  ;;  %v863_v10 = vstv %s2153_s10 }
 0x1b6   : > { %v680_v8 = vadd.f32 %v678_v22, %v667_v1  ;;  %v868_v11 = vstv %s2155_s1  ;;  %v873_v3 = vstv %s2157_s0  ;;  %v878_v56 = vstv %s2159_s11 }
 0x1b7   : > { %v809_v12 = vadd.f32 %v807_v53, %v796_v2 }
 0x1b8   : > { %v683_v13 = vmul.f32 %v682_v14, %v680_v8  ;;  %v687_v45 = vmul.f32 %v686_v15, %v680_v8  ;;  %v691_v57 = vmul.f32 %v690_v23, %v680_v8  ;;  %v695_v61 = vmul.f32 %v694_v24, %v680_v8 }
 0x1b9   : > { %v699_v18 = vmul.f32 %v698_v39, %v680_v8  ;;  %v703_v21 = vmul.f32 %v702_v62, %v680_v8  ;;  %v707_v25 = vmul.f32 %v706_v26, %v680_v8  ;;  %v711_v44 = vmul.f32 %v710_v27, %v680_v8 }
 0x1ba   : > { %v684_v14 = vadd.f32 %v683_v13, %v555_v55  ;;  %v688_v15 = vadd.f32 %v687_v45, %v559_v42  ;;  %v692_v19 = vadd.f32 %v691_v57, %v563_v58  ;;  %v696_v23 = vadd.f32 %v695_v61, %v567_v29 }
 0x1bb   : > { %v700_v20 = vadd.f32 %v699_v18, %v571_v37  ;;  %v704_v32 = vadd.f32 %v703_v21, %v575_v59  ;;  %v708_v24 = vadd.f32 %v707_v25, %v579_v60  ;;  %v712_v33 = vadd.f32 %v711_v44, %v583_v48 }
 0x1bc   : > { %v812_v39 = vmul.f32 %v811_v28, %v809_v12  ;;  %v816_v35 = vmul.f32 %v815_v30, %v809_v12  ;;  %v820_v62 = vmul.f32 %v819_v40, %v809_v12  ;;  %v824_v26 = vmul.f32 %v823_v31, %v809_v12 }
 0x1bd   : > { %v828_v27 = vmul.f32 %v827_v50, %v809_v12  ;;  %v832_v36 = vmul.f32 %v831_v0, %v809_v12  ;;  %v836_v38 = vmul.f32 %v835_v4, %v809_v12  ;;  %v840_v41 = vmul.f32 %v839_v5, %v809_v12 }
 0x1be   : > { %v813_v51 = vadd.f32 %v812_v39, %v684_v14  ;;  %v817_v43 = vadd.f32 %v816_v35, %v688_v15  ;;  %v821_v16 = vadd.f32 %v820_v62, %v692_v19  ;;  %v825_v47 = vadd.f32 %v824_v26, %v696_v23 }
 0x1bf   : > { %v829_v17 = vadd.f32 %v828_v27, %v700_v20  ;;  %v833_v22 = vadd.f32 %v832_v36, %v704_v32  ;;  %v837_v28 = vadd.f32 %v836_v38, %v708_v24  ;;  %v841_v34 = vadd.f32 %v840_v41, %v712_v33 }
 0x1c0   : > { %v844_v30 = vadd.f32 %v843_v6, %v813_v51  ;;  %v849_v40 = vadd.f32 %v848_v7, %v817_v43  ;;  %v854_v31 = vadd.f32 %v853_v49, %v821_v16  ;;  %v859_v46 = vadd.f32 %v858_v9, %v825_v47 }
 0x1c1   : > { %v864_v52 = vadd.f32 %v863_v10, %v829_v17  ;;  %v869_v54 = vadd.f32 %v868_v11, %v833_v22  ;;  %v874_v55 = vadd.f32 %v873_v3, %v837_v28  ;;  %v879_v42 = vadd.f32 %v878_v56, %v841_v34 }
 0x1c2   : > { %846 = vst.msk [vmem:[%s268_s21] sm:$0xff] %vm845_vm5, %v844_v30  ;;  %1118 = vst.msk [vmem:[%s268_s21 + $0x8] sm:$0xff] %vm845_vm5, %v849_v40 }
 0x1c3   : > { %1120 = vst.msk [vmem:[%s268_s21 + $0x10] sm:$0xff] %vm845_vm5, %v854_v31  ;;  %1122 = vst.msk [vmem:[%s268_s21 + $0x18] sm:$0xff] %vm845_vm5, %v859_v46 }
 0x1c4   : > { %1124 = vst.msk [vmem:[%s268_s21 + $0x20] sm:$0xff] %vm845_vm5, %v864_v52  ;;  %1126 = vst.msk [vmem:[%s268_s21 + $0x28] sm:$0xff] %vm845_vm5, %v869_v54 }
 0x1c5   : > { %1128 = vst.msk [vmem:[%s268_s21 + $0x30] sm:$0xff] %vm845_vm5, %v874_v55  ;;  %1130 = vst.msk [vmem:[%s268_s21 + $0x38] sm:$0xff] %vm845_vm5, %v879_v42 }
 0x1c6   : > { %1367 = shalt.err (!%p1364_p9)
}
 0x1c7   : > { %s1368_s24 = scalar_lea.hbm %s2209_s4, 1024  ;;  %s1372_s6 = scalar_lea.hbm %s2343_s5, 4096 }
 0x1c8   : > { %p1369_p1 = scmp.ne.s32.totalorder %s2209_s4, %s1368_s24  ;;  %p1373_p6 = scmp.lt.u32.totalorder %s2209_s4, %s2343_s5 }
 0x1c9   : > { %p1374_p3 = scmp.lt.u32.totalorder %s1372_s6, %s1368_s24  ;;  %p1376_p8 = scmp.lt.u32.totalorder %s1368_s24, %s2209_s4 }
 0x1ca   : > { %p1370_p11 = pnand %p1369_p1, %p2345_p10 }
 0x1cb   : > { %p1375_p7 = por %p1374_p3, %p1373_p6 }
 0x1cc   : > { %p1371_p2 = pneg %p1370_p11 }
 0x1cd   : > { %p1377_p12 = por %p1376_p8, %p1375_p7 }
 0x1cf   : > { %p1378_p0 = pnand %p1377_p12, %p1371_p2 }
 0x1d1   : > { %1381 = shalt.err (!%p1378_p0)
}
 0x1d2   : > { %s1497_s23 = smov 128   ;;  %s1498_s26 = smov 256  }
 0x1d3   : > { %s1499_s28 = smov 8  }
 0x1d4   : > { %1151 = dma.vmem_to_hbm [thread:$0]  (%p2345_p10), %s2211_s9, 1024, %s2209_s4, %s2223_s18, %s1497_s23, %s1498_s26, %s1499_s28  }
 0x1d5 PF: > { %s2346_s10 = sld [smem:[#allocation22_spill]]  ;;  %s2347_s1 = sld [smem:[#allocation16_spill]] }
 0x1d6   : > { %s2348_s0 = sld [smem:[#allocation24_spill]] }
 0x1db   : > { %p1178_p13 = scmp.ge.s32.totalorder %s2346_s10, 2  ;;  %s912_s11 = sand.u32 1, %s2347_s1  }
 0x1dc   : > { %p2349_p4 = scmp.ne.s32.totalorder %s2348_s0, 0  ;;  %s913_s7 = scalar_lea.sflag [#allocation5], %s912_s11 }
 0x1de   : > { %p1168_p5 = pnand %p1178_p13, %p2349_p4 }
 0x1e0   : > { %1439 = dma.done.wait (!%p1168_p5), %s913_s7, 1024  }
 0x1e1   : > { %1441 = vsyncadd (!%p1168_p5), %s913_s7, 4294966272  ;;  %s22_s25 = sadd.s32 1, %s2346_s10   ;;  %s2350_s12 = sld [smem:[#allocation17_spill]] }
 0x1e2   : > { %p19_p9 = scmp.ge.s32.totalorder %s22_s25, 6   ;;  %s2351_s17 = sld [smem:[#allocation28_spill]] }
 0x1e3   : > { %s2352_s18 = sld [smem:[#allocation18_spill]]  ;;  %s2353_s19 = sld [smem:[#allocation19_spill]] }
 0x1e4   : > { %s2354_s20 = sld [smem:[#allocation27_spill]]  ;;  %s2355_s21 = sld [smem:[#allocation20_spill]] }
 0x1e5   : > { %s2356_s22 = sld [smem:[#allocation21_spill]]  ;;  %s2357_s23 = sld [smem:[#allocation25_spill]] }
 0x1e6   : > { %s2358_s24 = sld [smem:[#allocation26_spill]]  ;;  %s2359_s15 = smov %s1448_s16 }
 0x1e7   : > { %s2360_s16 = smov %s2350_s12  ;;  %21 = sbr.rel (!%p19_p9) target bundleno = 17 (0x11), region = 105 }
 0x1ee   :  { %918 = vsyncpa [#allocation4], 1 }
 0x1ef   :  { %920 = vsyncpa [#allocation4 + $0x1], 1 }
 0x1f0   :  { %921 = vsyncpa [#allocation5], 1 }
 0x1f1   :  { %923 = vsyncpa [#allocation5 + $0x1], 1 }
 0x1f2   :  { %924 = vsyncpa [#allocation6], 1 }
 0x1f3   :  { %926 = vsyncpa [#allocation6 + $0x1], 1 }
 0x1f4   :  { %927 = vsyncpa [#allocation8], 1 }

</bundles_post_ra>
